<compile_context>
chip_gen: v7x
topology: tpu7x:2x2x1
jax: 0.10.0
libtpu: 0.0.40
codegen_flags: <defaults>
</compile_context>

<pallas_src>
import functools

import jax
import jax.numpy as jnp
from jax import lax
from jax.experimental import pallas as pl
from jax.experimental.pallas import tpu as pltpu

_LANE = 256  # batch-tile granularity: multiple of 128 (v5e) and 256 (v6e/v7x MXU width)


def _mlp_kernel(x_ref, w0_ref, b0_ref, wh_ref, bh_ref, we_ref, be_ref, o_ref,
                *, n_hidden_layers, act_dtype, precision):
    """One batch tile; activations are batch-on-lanes (features, TB).

    x_ref:  (TB, n_input)                         -- natural input layout
    w0_ref: (n_hidden, n_input)                   b0_ref: (n_hidden, 1)
    wh_ref: (max(L-1,1), n_hidden, n_hidden)      bh_ref: (max(L-1,1), n_hidden, 1)
    we_ref: (n_output, n_hidden)                  be_ref: (n_output, 1)
    o_ref:  (n_output, TB)
    """
    x = x_ref[...]                                 # (TB, n_input)

    # --- fcs: z = W0 . x^T + b0 -> (n_hidden, TB).  NT dot_general contracts the
    # shared n_input axis, folding the (TB, n_input) -> (n_input, TB) relayout into
    # the (idle) MXU instead of a wrapper-side HBM transpose pass.
    z = lax.dot_general(
        w0_ref[...], x,
        dimension_numbers=(((1,), (1,)), ((), ())),
        preferred_element_type=jnp.float32,
        precision=precision,
    ) + b0_ref[...]
    h = jnp.tanh(z.astype(act_dtype))

    # --- fch: (n_layers - 1) x [Linear(n_hidden, n_hidden) + Tanh] -------------
    # Static Python loop: layer count is known at trace time.
    for l in range(n_hidden_layers):
        z = jnp.dot(wh_ref[l], h, preferred_element_type=jnp.float32,
                    precision=precision) + bh_ref[l]
        h = jnp.tanh(z.astype(act_dtype))

    # --- fce: Linear(n_hidden, n_output), no activation; lane-dense store ------
    o_ref[...] = (
        jnp.dot(we_ref[...], h, preferred_element_type=jnp.float32,
                precision=precision) + be_ref[...]
    ).astype(o_ref.dtype)


def _pick_tile(batch, tile_b):
    """Large tile (amortizes ~0.35us/grid-step), but keep >= 2 tiles when the batch
    allows so dimension_semantics=("parallel",) can split across both v7x TCs."""
    tile_b = max(_LANE, (tile_b // _LANE) * _LANE)
    if batch > tile_b:
        return tile_b
    if batch >= 2 * _LANE:
        half = -(-batch // 2)                     # ceil(batch / 2)
        return -(-half // _LANE) * _LANE          # round up to _LANE
    return _LANE


def nn_forward(x, params, *, tile_b=4096, bf16_act=False):
    """x: (B, n_input) float32; params in PyTorch-native (out, in) weight layout.
    Returns (B, n_output) float32."""
    B, n_input = x.shape
    n_hidden = params["w0"].shape[0]
    n_output = params["we"].shape[0]
    n_hidden_layers = params["wh"].shape[0]

    if B == 0:                                    # guard: zero-size grid
        return jnp.zeros((0, n_output), jnp.float32)

    tile_b = _pick_tile(B, tile_b)
    grid_b = pl.cdiv(B, tile_b)                   # ragged last tile masked by Pallas

    act_dtype = jnp.bfloat16 if bf16_act else jnp.float32
    w_dtype = jnp.bfloat16 if bf16_act else jnp.float32
    precision = lax.Precision.DEFAULT if bf16_act else lax.Precision.HIGHEST

    # n_layers == 1 -> empty fch; pass dummy, never-read hidden weights.
    if n_hidden_layers == 0:
        wh = jnp.zeros((1, n_hidden, n_hidden), w_dtype)
        bh = jnp.zeros((1, n_hidden, 1), jnp.float32)
    else:
        wh = params["wh"].astype(w_dtype)
        bh = params["bh"]
    wh_blocks = wh.shape[0]
    we = params["we"].astype(w_dtype)

    kernel = functools.partial(
        _mlp_kernel, n_hidden_layers=n_hidden_layers,
        act_dtype=act_dtype, precision=precision)

    # Rough (lane/sublane-padded) VMEM footprint; raise the scoped limit only when it
    # would outgrow v5e's conservative default.
    pad_l = lambda d: -(-d // 128) * 128
    pad_s = lambda d: -(-d // 8) * 8
    est = (2 * pad_s(tile_b) * pad_l(n_input) * 4            # x tile, double-buffered
           + 2 * pad_s(n_output) * tile_b * 4                # out tile, double-buffered
           + 6 * pad_s(n_hidden) * tile_b * 4                # live activations (headroom)
           + 2 * (wh_blocks + 2) * pad_s(n_hidden) * pad_l(n_hidden) * 4)  # weights
    compiler_kwargs = dict(dimension_semantics=("parallel",))
    if est > 12 * 2 ** 20:
        compiler_kwargs["vmem_limit_bytes"] = int(min(2 * est, 64 * 2 ** 20))

    # Weights/biases: constant index maps -> per-step DMA elided, resident in VMEM.
    full = lambda shape: pl.BlockSpec(shape, lambda i: (0,) * len(shape))

    out_t = pl.pallas_call(
        kernel,
        out_shape=jax.ShapeDtypeStruct((n_output, B), jnp.float32),
        grid_spec=pltpu.PrefetchScalarGridSpec(
            num_scalar_prefetch=0,
            grid=(grid_b,),
            in_specs=[
                pl.BlockSpec((tile_b, n_input), lambda i: (i, 0)),   # x, natural layout
                full((n_hidden, n_input)),                           # w0
                full((n_hidden, 1)),                                 # b0
                full((wh_blocks, n_hidden, n_hidden)),               # wh
                full((wh_blocks, n_hidden, 1)),                      # bh
                full((n_output, n_hidden)),                          # we
                full((n_output, 1)),                                 # be
            ],
            out_specs=pl.BlockSpec((n_output, tile_b), lambda i: (0, i)),
        ),
        compiler_params=pltpu.CompilerParams(**compiler_kwargs),
    )(x, params["w0"], params["b0"], wh, bh, we, params["be"])

    # Tiny (n_output, B) -> (B, n_output) relayout to match the PyTorch signature.
    return out_t.T


def init_params(key, n_input, n_output, n_hidden, n_layers):
    """Deterministic synthetic parameters; weights in PyTorch-native (out, in) layout."""
    ks = jax.random.split(key, 6)
    L = n_layers - 1
    return {
        "w0": 0.1 * jax.random.normal(ks[0], (n_hidden, n_input), jnp.float32),
        "b0": 0.1 * jax.random.normal(ks[1], (n_hidden, 1), jnp.float32),
        "wh": 0.1 * jax.random.normal(ks[2], (L, n_hidden, n_hidden), jnp.float32),
        "bh": 0.1 * jax.random.normal(ks[3], (L, n_hidden, 1), jnp.float32),
        "we": 0.1 * jax.random.normal(ks[4], (n_output, n_hidden), jnp.float32),
        "be": 0.1 * jax.random.normal(ks[5], (n_output, 1), jnp.float32),
    }


def reference_forward(x, params):
    """Pure-JAX reference of the PyTorch forward (high-precision matmuls)."""
    dot = lambda a, b: jnp.dot(a, b, precision=lax.Precision.HIGHEST)
    h = jnp.tanh(dot(x, params["w0"].T) + params["b0"][:, 0])
    for l in range(params["wh"].shape[0]):
        h = jnp.tanh(dot(h, params["wh"][l].T) + params["bh"][l, :, 0])
    return dot(h, params["we"].T) + params["be"][:, 0]


if __name__ == "__main__":
    # Small shapes consistent with the module's forward.
    n_input, n_hidden, n_layers, n_output = 4, 32, 3, 2

    key = jax.random.PRNGKey(0)
    kx, kp = jax.random.split(key)
    params = init_params(kp, n_input, n_output, n_hidden, n_layers)

    # Case 1: B=512 -> auto tile 256, grid=2 (both v7x TCs via "parallel").
    B1 = 512
    x1 = jax.random.normal(kx, (B1, n_input), jnp.float32)
    out1 = jax.block_until_ready(nn_forward(x1, params))
    ref1 = reference_forward(x1, params)
    assert out1.shape == (B1, n_output)
    assert jnp.allclose(out1, ref1, atol=1e-4, rtol=1e-4), "mismatch (B=512, f32)"

    # Case 2: ragged batch (B=100 < one 256-wide tile) -> Pallas block-masking path.
    B2 = 100
    x2 = x1[:B2]
    out2 = jax.block_until_ready(nn_forward(x2, params))
    ref2 = reference_forward(x2, params)
    assert out2.shape == (B2, n_output)
    assert jnp.allclose(out2, ref2, atol=1e-4, rtol=1e-4), "mismatch (B=100, f32)"

    # Case 3: bf16 activation/tanh path (EUP lever on v6e/v7x) -- loose smoke check.
    out3 = jax.block_until_ready(nn_forward(x1, params, bf16_act=True))
    assert out3.shape == (B1, n_output)
    assert bool(jnp.all(jnp.isfinite(out3)))
    assert jnp.allclose(out3, ref1, atol=1e-1, rtol=1e-1), "mismatch (B=512, bf16)"

    print("KERNEL_OK")
</pallas_src>

<mosaic_0001>
module attributes {stable_mosaic.version = 11 : i64} {
  func.func @_mlp_kernel(%arg0: i32, %arg1: memref<256x4xf32, #tpu.memory_space<vmem>>, %arg2: memref<32x4xf32, #tpu.memory_space<vmem>>, %arg3: memref<32x1xf32, #tpu.memory_space<vmem>>, %arg4: memref<2x32x32xf32, #tpu.memory_space<vmem>>, %arg5: memref<2x32x1xf32, #tpu.memory_space<vmem>>, %arg6: memref<2x32xf32, #tpu.memory_space<vmem>>, %arg7: memref<2x1xf32, #tpu.memory_space<vmem>>, %arg8: memref<2x256xf32, #tpu.memory_space<vmem>>) attributes {dimension_semantics = [#tpu.dimension_semantics<parallel>], iteration_bounds = array<i64: 2>, scalar_prefetch = 0 : i64, scratch_operands = 0 : i64, tpu.core_type = #tpu.core_type<tc>, window_params = [{transform_indices = @transform_0, window_bounds = array<i64: 256, 4>}, {pipeline_mode = #tpu.pipeline_mode<synchronous>, transform_indices = @transform_1, window_bounds = array<i64: 32, 4>}, {pipeline_mode = #tpu.pipeline_mode<synchronous>, transform_indices = @transform_2, window_bounds = array<i64: 32, 1>}, {pipeline_mode = #tpu.pipeline_mode<synchronous>, transform_indices = @transform_3, window_bounds = array<i64: 2, 32, 32>}, {pipeline_mode = #tpu.pipeline_mode<synchronous>, transform_indices = @transform_4, window_bounds = array<i64: 2, 32, 1>}, {pipeline_mode = #tpu.pipeline_mode<synchronous>, transform_indices = @transform_5, window_bounds = array<i64: 2, 32>}, {pipeline_mode = #tpu.pipeline_mode<synchronous>, transform_indices = @transform_6, window_bounds = array<i64: 2, 1>}, {transform_indices = @transform_7, window_bounds = array<i64: 2, 256>}]} {
    %c0 = arith.constant 0 : index
    %c0_0 = arith.constant 0 : index
    %0 = vector.load %arg1[%c0, %c0_0] : memref<256x4xf32, #tpu.memory_space<vmem>>, vector<256x4xf32>
    %c0_1 = arith.constant 0 : index
    %c0_2 = arith.constant 0 : index
    %1 = vector.load %arg2[%c0_1, %c0_2] : memref<32x4xf32, #tpu.memory_space<vmem>>, vector<32x4xf32>
    %cst = arith.constant dense<0.000000e+00> : vector<32x256xf32>
    %2 = tpu.matmul %1, %0, %cst {dimension_numbers = #tpu.dot_dimension_numbers<[1], [1], [0], [0], [0, 0, 1, 0], [], []>, precision = #tpu.contract_precision<fp32>} : vector<32x4xf32>, vector<256x4xf32>, vector<32x256xf32> -> vector<32x256xf32>
    %c0_3 = arith.constant 0 : index
    %c0_4 = arith.constant 0 : index
    %3 = vector.load %arg3[%c0_3, %c0_4] : memref<32x1xf32, #tpu.memory_space<vmem>>, vector<32x1xf32>
    %4 = vector.broadcast %3 : vector<32x1xf32> to vector<32x256xf32>
    %5 = arith.addf %2, %4 : vector<32x256xf32>
    %6 = math.tanh %5 : vector<32x256xf32>
    %c0_5 = arith.constant 0 : index
    %c0_6 = arith.constant 0 : index
    %c0_7 = arith.constant 0 : index
    %7 = vector.load %arg4[%c0_5, %c0_6, %c0_7] : memref<2x32x32xf32, #tpu.memory_space<vmem>>, vector<1x32x32xf32>
    %8 = vector.shape_cast %7 : vector<1x32x32xf32> to vector<32x32xf32>
    %cst_8 = arith.constant dense<0.000000e+00> : vector<32x256xf32>
    %9 = tpu.matmul %8, %6, %cst_8 {dimension_numbers = #tpu.dot_dimension_numbers<[1], [0], [0], [1], [0, 0, 1, 1], [], []>, precision = #tpu.contract_precision<fp32>} : vector<32x32xf32>, vector<32x256xf32>, vector<32x256xf32> -> vector<32x256xf32>
    %c0_9 = arith.constant 0 : index
    %c0_10 = arith.constant 0 : index
    %c0_11 = arith.constant 0 : index
    %10 = vector.load %arg5[%c0_9, %c0_10, %c0_11] : memref<2x32x1xf32, #tpu.memory_space<vmem>>, vector<1x32x1xf32>
    %11 = vector.shape_cast %10 : vector<1x32x1xf32> to vector<32x1xf32>
    %12 = vector.broadcast %11 : vector<32x1xf32> to vector<32x256xf32>
    %13 = arith.addf %9, %12 : vector<32x256xf32>
    %14 = math.tanh %13 : vector<32x256xf32>
    %c1 = arith.constant 1 : index
    %c0_12 = arith.constant 0 : index
    %c0_13 = arith.constant 0 : index
    %15 = vector.load %arg4[%c1, %c0_12, %c0_13] : memref<2x32x32xf32, #tpu.memory_space<vmem>>, vector<1x32x32xf32>
    %16 = vector.shape_cast %15 : vector<1x32x32xf32> to vector<32x32xf32>
    %cst_14 = arith.constant dense<0.000000e+00> : vector<32x256xf32>
    %17 = tpu.matmul %16, %14, %cst_14 {dimension_numbers = #tpu.dot_dimension_numbers<[1], [0], [0], [1], [0, 0, 1, 1], [], []>, precision = #tpu.contract_precision<fp32>} : vector<32x32xf32>, vector<32x256xf32>, vector<32x256xf32> -> vector<32x256xf32>
    %c1_15 = arith.constant 1 : index
    %c0_16 = arith.constant 0 : index
    %c0_17 = arith.constant 0 : index
    %18 = vector.load %arg5[%c1_15, %c0_16, %c0_17] : memref<2x32x1xf32, #tpu.memory_space<vmem>>, vector<1x32x1xf32>
    %19 = vector.shape_cast %18 : vector<1x32x1xf32> to vector<32x1xf32>
    %20 = vector.broadcast %19 : vector<32x1xf32> to vector<32x256xf32>
    %21 = arith.addf %17, %20 : vector<32x256xf32>
    %22 = math.tanh %21 : vector<32x256xf32>
    %c0_18 = arith.constant 0 : index
    %c0_19 = arith.constant 0 : index
    %23 = vector.load %arg6[%c0_18, %c0_19] : memref<2x32xf32, #tpu.memory_space<vmem>>, vector<2x32xf32>
    %cst_20 = arith.constant dense<0.000000e+00> : vector<2x256xf32>
    %24 = tpu.matmul %23, %22, %cst_20 {dimension_numbers = #tpu.dot_dimension_numbers<[1], [0], [0], [1], [0, 0, 1, 1], [], []>, precision = #tpu.contract_precision<fp32>} : vector<2x32xf32>, vector<32x256xf32>, vector<2x256xf32> -> vector<2x256xf32>
    %c0_21 = arith.constant 0 : index
    %c0_22 = arith.constant 0 : index
    %25 = vector.load %arg7[%c0_21, %c0_22] : memref<2x1xf32, #tpu.memory_space<vmem>>, vector<2x1xf32>
    %26 = vector.broadcast %25 : vector<2x1xf32> to vector<2x256xf32>
    %27 = arith.addf %24, %26 : vector<2x256xf32>
    %c0_23 = arith.constant 0 : index
    %c0_24 = arith.constant 0 : index
    %28 = vector.load %arg8[%c0_23, %c0_24] : memref<2x256xf32, #tpu.memory_space<vmem>>, vector<2x256xf32>
    tpu.vector_store %arg8[%c0_23, %c0_24], %27 {strides = array<i32>} : memref<2x256xf32, #tpu.memory_space<vmem>>, vector<2x256xf32>,
    return
  }
  func.func @transform_0(%arg0: i32) -> (i32, i32) {
    %c0_i32 = arith.constant 0 : i32
    %c0_i32_0 = arith.constant 0 : i32
    return %arg0, %c0_i32 : i32, i32
  }
  func.func @transform_1(%arg0: i32) -> (i32, i32) {
    %c0_i32 = arith.constant 0 : i32
    %c0_i32_0 = arith.constant 0 : i32
    %c0_i32_1 = arith.constant 0 : i32
    return %c0_i32, %c0_i32_0 : i32, i32
  }
  func.func @transform_2(%arg0: i32) -> (i32, i32) {
    %c0_i32 = arith.constant 0 : i32
    %c0_i32_0 = arith.constant 0 : i32
    %c0_i32_1 = arith.constant 0 : i32
    return %c0_i32, %c0_i32_0 : i32, i32
  }
  func.func @transform_3(%arg0: i32) -> (i32, i32, i32) {
    %c0_i32 = arith.constant 0 : i32
    %c0_i32_0 = arith.constant 0 : i32
    %c0_i32_1 = arith.constant 0 : i32
    %c0_i32_2 = arith.constant 0 : i32
    return %c0_i32, %c0_i32_0, %c0_i32_1 : i32, i32, i32
  }
  func.func @transform_4(%arg0: i32) -> (i32, i32, i32) {
    %c0_i32 = arith.constant 0 : i32
    %c0_i32_0 = arith.constant 0 : i32
    %c0_i32_1 = arith.constant 0 : i32
    %c0_i32_2 = arith.constant 0 : i32
    return %c0_i32, %c0_i32_0, %c0_i32_1 : i32, i32, i32
  }
  func.func @transform_5(%arg0: i32) -> (i32, i32) {
    %c0_i32 = arith.constant 0 : i32
    %c0_i32_0 = arith.constant 0 : i32
    %c0_i32_1 = arith.constant 0 : i32
    return %c0_i32, %c0_i32_0 : i32, i32
  }
  func.func @transform_6(%arg0: i32) -> (i32, i32) {
    %c0_i32 = arith.constant 0 : i32
    %c0_i32_0 = arith.constant 0 : i32
    %c0_i32_1 = arith.constant 0 : i32
    return %c0_i32, %c0_i32_0 : i32, i32
  }
  func.func @transform_7(%arg0: i32) -> (i32, i32) {
    %c0_i32 = arith.constant 0 : i32
    %c0_i32_0 = arith.constant 0 : i32
    return %c0_i32, %arg0 : i32, i32
  }
}

</mosaic_0001>

<bundles_post_ra>
// kernel: tpu_custom_call.1
= control target key start
LH: loop header
LB: loop body
LE: loop exit
PB: predicated region body
PF: predicated region fallthrough
CT: control target
= control target key end

     0   :  { %12 = vsyncpa [#allocation3], 0  ;;  %s5815_s0 = inlined_call_operand.vmem [shape: f32[512,4], index: 0, kind: input, shape index: {}]   ;;  %s5816_s1 = inlined_call_operand.vmem [shape: f32[32,4], index: 1, kind: input, shape index: {}]   ;;  %s5817_s2 = inlined_call_operand.vmem [shape: f32[32,1], index: 2, kind: input, shape index: {}]   ;;  %s5818_s3 = inlined_call_operand.vmem [shape: f32[2,32,32], index: 3, kind: input, shape index: {}]   ;;  %s5819_s4 = inlined_call_operand.vmem [shape: f32[2,32,1], index: 4, kind: input, shape index: {}]   ;;  %s5820_s5 = inlined_call_operand.vmem [shape: f32[2,32], index: 5, kind: input, shape index: {}]   ;;  %s5821_s6 = inlined_call_operand.vmem [shape: f32[2,1], index: 6, kind: input, shape index: {}]   ;;  %s5822_s7 = inlined_call_operand.hbm [shape: f32[2,512], index: 7, kind: output, shape index: {}]  }
   0x1   :  { %14 = vsyncpa [#allocation3 + $0x1], 0  ;;  %s4529_s24 = smov 0   ;;  %s4531_s25 = smov 0  }
   0x2   :  { %s4533_s26 = smov 0   ;;  %s4535_s27 = smov 0  }
   0x3 LB: > { %s4550_s28 = sadd.s32 4294967295, %s4484_s27   ;;  %s3577_s29 = sadd.s32 4294967294, %s4484_s27   ;;  %s4484_s27 = sphi %s4535_s27, %s6041_s27   ;;  %s4480_s26 = sphi %s4533_s26, %s6040_s26   ;;  %s4476_s25 = sphi %s4531_s25, %s6039_s25   ;;  %s4472_s24 = sphi %s4529_s24, %s6038_s24  }
   0x4   : > { %s4554_s30 = sadd.s32 1, %s4484_s27   ;;  %s179_s8 = sadd.s32 1, %s4480_s26 }
   0x5   : > { %s176_s9 = ssub.s32 %s4484_s27, %s4554_s30  ;;  %p189_p0 = scmp.ne.s32.totalorder %s4480_s26, %s4476_s25 }
   0x6   : > { %p177_p1 = scmp.eq.s32.totalorder %s176_s9, 0  ;;  %p190_p2 = scmp.eq.s32.totalorder %s4550_s28, 1 }
   0x7   : > { %p195_p3 = scmp.ne.s32.totalorder %s4476_s25, %s4472_s24  ;;  %p196_p4 = scmp.eq.s32.totalorder %s3577_s29, 1 }
   0x8   : > { %s4565_s10 = scalar_select %p177_p1, %s4480_s26, %s179_s8  }
   0x9   : > { %p4567_p5 = por %p190_p2, %p189_p0  ;;  %p4571_p6 = por %p196_p4, %p195_p3 }
   0xa   : > { %p3580_p7 = scmp.ge.s32.totalorder %s4484_s27, 1  ;;  %p241_p8 = scmp.lt.s32.totalorder %s4484_s27, 3 }
   0xc   : > { %p242_p9 = pnand %p3580_p7, %p241_p8 }
   0xe   : > { %245 = sbr.rel (%p242_p9) target bundleno = 1530 (0x5fa), region = 48 }
  0x15   : > { %s3582_s13 = sshll.u32 %s4550_s28, 5  ;;  %vm340_vm0 = vcmask 31744   ;;  %v312_v0 = vld [vmem:[%s5816_s1] sm:$0xff]  ;;  %vm1487_vm1 = vcmask 261120   ;;  %s270_s14 = sand.u32 1, %s4476_s25  }
  0x16   : > { %p274_p10 = scmp.lt.s32.totalorder %s3582_s13, 63  ;;  %v4582_v1 = vsel %vm340_vm0, %v312_v0, 0  ;;  %s3581_s15 = sshll.u32 %s270_s14, 2 }
  0x17   : > { %5900 = vst [vmem:[#allocation5_spill] sm:$0xff] %v4582_v1  ;;  %v4585_v2 = vand.u32 4294901760, %v4582_v1  ;;  %s272_s17 = scalar_lea.vmem [#allocation2], %s3581_s15  ;;  %s3504_s22 = scalar_lea.sflag [#allocation3], %s270_s14 }
  0x18   : > { %s6043_s13 = smov (!%p274_p10, %s3582_s13), 63  ;;  %s3518_s18 = sshll.u32 %s272_s17, 4  ;;  %s5775_s18 = int_to_ptr.vmem [resolvable:$true] %s3518_s18 }
  0x19   : > { %3671 = vmatprep.mubr.f32.mxu0 %v4585_v2  ;;  %s3583_s16 = sshll.u32 %s6043_s13, 3  ;;  %s4422_s23 = scalar_lea.vmem %s5775_s18, 64 }
  0x1a   : > { %s4591_s19 = scalar_lea.vmem %s5815_s0, %s3583_s16  ;;  %s3598_s16 = sshll.u32 %s4550_s28, 6 }
  0x1b   : > { %v296_v3 = vld [vmem:[%s4591_s19 + $0x80] sm:$0xff]  ;;  %v297_v4 = vld [vmem:[%s4591_s19 + $0x88] sm:$0xff]  ;;  %v298_v10 = vld [vmem:[%s4591_s19 + $0x90] sm:$0xff]  ;;  %s5773_s21 = scalar_lea.hbm %s5822_s7, %s3598_s16  ;;  %p4423_p11 = scmp.ne.s32.totalorder %s5775_s18, %s4422_s23 }
  0x1c   : > { %v280_v5 = vld [vmem:[%s4591_s19] sm:$0xff]  ;;  %v4597_v6 = vsel %vm340_vm0, %v296_v3, 0  ;;  %v4600_v7 = vsel %vm340_vm0, %v297_v4, 0  ;;  %v281_v8 = vld [vmem:[%s4591_s19 + $0x8] sm:$0xff]  ;;  %v299_v11 = vld [vmem:[%s4591_s19 + $0x98] sm:$0xff]  ;;  %v4618_v19 = vsel %vm340_vm0, %v298_v10, 0 }
  0x1d   : > { %v4604_v9 = vsel %vm340_vm0, %v280_v5, 0  ;;  %v5862_v12 = vand.u32 4294901760, %v4597_v6  ;;  %v5861_v13 = vand.u32 4294901760, %v4600_v7  ;;  %v4611_v14 = vsel %vm340_vm0, %v281_v8, 0  ;;  %v282_v16 = vld [vmem:[%s4591_s19 + $0x10] sm:$0xff]  ;;  %v283_v17 = vld [vmem:[%s4591_s19 + $0x18] sm:$0xff]  ;;  %p4424_p12 = pnand %p4423_p11, %p4567_p5 }
  0x1e   : > { %v5860_v15 = vand.u32 4294901760, %v4604_v9  ;;  %v5858_v18 = vand.u32 4294901760, %v4611_v14  ;;  %v4621_v20 = vsel %vm340_vm0, %v299_v11, 0  ;;  %v4624_v21 = vsel %vm340_vm0, %v282_v16, 0  ;;  %v300_v46 = vld [vmem:[%s4591_s19 + $0xa0] sm:$0xff]  ;;  %v301_v47 = vld [vmem:[%s4591_s19 + $0xa8] sm:$0xff] }
  0x1f   : > { %v4629_v22 = vsub.f32 %v4597_v6, %v5862_v12  ;;  %v4634_v23 = vsub.f32 %v4600_v7, %v5861_v13  ;;  %v5856_v25 = vand.u32 4294901760, %v4618_v19  ;;  %v5851_v27 = vand.u32 4294901760, %v4621_v20  ;;  %v284_v56 = vld [vmem:[%s4591_s19 + $0x20] sm:$0xff]  ;;  %v285_v57 = vld [vmem:[%s4591_s19 + $0x28] sm:$0xff]  ;;  %v302_v4 = vld [vmem:[%s4591_s19 + $0xb0] sm:$0xff]  ;;  %p4425_p13 = pneg %p4424_p12  ;;  %s4488_s28 = smov [#allocation2]  }
  0x20   : > { %v4639_v24 = vsub.f32 %v4604_v9, %v5860_v15  ;;  %v4645_v26 = vsub.f32 %v4611_v14, %v5858_v18  ;;  %v4649_v28 = vsel %vm340_vm0, %v283_v17, 0  ;;  %v5850_v29 = vand.u32 4294901760, %v4624_v21  ;;  %v303_v5 = vld [vmem:[%s4591_s19 + $0xb8] sm:$0xff]  ;;  %s4426_s29 = sshll.u32 %s4488_s28, 4  ;;  %s4427_s29 = int_to_ptr.vmem [resolvable:$false] %s4426_s29 }
  0x21   : > { %v5842_v30 = vand.u32 4294901760, %v4629_v22  ;;  %v5839_v31 = vand.u32 4294901760, %v4634_v23  ;;  %v4658_v33 = vsub.f32 %v4618_v19, %v5856_v25  ;;  %v4664_v35 = vsub.f32 %v4621_v20, %v5851_v27  ;;  %s4428_s8 = scalar_lea.vmem %s4427_s29, 128  ;;  %p4429_p0 = scmp.lt.s32.totalorder %s5775_s18, %s4427_s29 }
  0x22   : > { %5901 = vst [vmem:[#allocation6_spill] sm:$0xff] %v4645_v26  ;;  %v5832_v32 = vand.u32 4294901760, %v4639_v24  ;;  %v5830_v34 = vand.u32 4294901760, %v4645_v26  ;;  %v5849_v36 = vand.u32 4294901760, %v4649_v28  ;;  %v4670_v37 = vsub.f32 %v4624_v21, %v5850_v29  ;;  %p4430_p1 = scmp.lt.s32.totalorder %s4428_s8, %s4422_s23 }
  0x23   : > { %5902 = vst [vmem:[#allocation7_spill] sm:$0xff] %v4664_v35  ;;  %v706_v38 = vsub.f32 %v4629_v22, %v5842_v30  ;;  %v713_v39 = vsub.f32 %v4634_v23, %v5839_v31  ;;  %v5828_v41 = vand.u32 4294901760, %v4658_v33  ;;  %v5827_v43 = vand.u32 4294901760, %v4664_v35  ;;  %v307_v30 = vld [vmem:[%s4591_s19 + $0xd8] sm:$0xff] }
  0x24   : > { %v594_v40 = vsub.f32 %v4639_v24, %v5832_v32  ;;  %v601_v42 = vsub.f32 %v4645_v26, %v5830_v34  ;;  %v5826_v44 = vand.u32 4294901760, %v4670_v37  ;;  %v4690_v45 = vsub.f32 %v4649_v28, %v5849_v36  ;;  %v305_v34 = vld [vmem:[%s4591_s19 + $0xc8] sm:$0xff]  ;;  %p4431_p2 = por %p4430_p1, %p4429_p0 }
  0x25   : > { %v707_v48 = vand.u32 4294901760, %v706_v38  ;;  %v714_v49 = vand.u32 4294901760, %v713_v39  ;;  %v720_v51 = vsub.f32 %v4658_v33, %v5828_v41  ;;  %v727_v53 = vsub.f32 %v4664_v35, %v5827_v43 }
  0x26   : > { %v595_v50 = vand.u32 4294901760, %v594_v40  ;;  %v602_v52 = vand.u32 4294901760, %v601_v42  ;;  %v608_v54 = vsub.f32 %v4670_v37, %v5826_v44  ;;  %v5824_v55 = vand.u32 4294901760, %v4690_v45  ;;  %v286_v42 = vld [vmem:[%s4591_s19 + $0x30] sm:$0xff]  ;;  %p4432_p3 = pnand %p4431_p2, %p4425_p13 }
  0x27   : > { %v3871_v58 = vpack.c.bf16 %v714_v49, %v707_v48  ;;  %v721_v59 = vand.u32 4294901760, %v720_v51  ;;  %v4707_v60 = vsel %vm340_vm0, %v300_v46, 0  ;;  %v4710_v61 = vsel %vm340_vm0, %v301_v47, 0 }
  0x28   : > { %v3873_v62 = vpack.c.bf16 %v602_v52, %v595_v50  ;;  %v728_v63 = vand.u32 4294901760, %v727_v53  ;;  %v609_v0 = vand.u32 4294901760, %v608_v54  ;;  %v615_v3 = vsub.f32 %v4690_v45, %v5824_v55  ;;  %v287_v50 = vld [vmem:[%s4591_s19 + $0x38] sm:$0xff] }
  0x29   : > { %3872 = vmatprep.subr.bf16.mxu0 %v3871_v58  ;;  %v5846_v8 = vand.u32 4294901760, %v4707_v60  ;;  %v5845_v10 = vand.u32 4294901760, %v4710_v61  ;;  %v4720_v11 = vsel %vm340_vm0, %v284_v56, 0  ;;  %v4723_v16 = vsel %vm340_vm0, %v285_v57, 0 }
  0x2a   : > { %3874 = vmatpush3.bf16.xpose.msra.mxu0 %v3873_v62  ;;  %v3875_v17 = vpack.c.bf16 %v728_v63, %v721_v59  ;;  %v616_v38 = vand.u32 4294901760, %v615_v3  ;;  %v5838_v39 = vand.u32 4294901760, %v4720_v11  ;;  %v5836_v40 = vand.u32 4294901760, %v4723_v16 }
  0x2b   : > { %v4731_v46 = vsub.f32 %v4707_v60, %v5846_v8  ;;  %v4736_v47 = vsub.f32 %v4710_v61, %v5845_v10  ;;  %v4739_v48 = vsel %vm340_vm0, %v302_v4, 0  ;;  %v4742_v49 = vsel %vm340_vm0, %v303_v5, 0 }
  0x2c   : > { %3876 = vmatprep.subr.bf16.mxu0 %v3875_v17  ;;  %v3877_v51 = vpack.c.bf16 %v616_v38, %v609_v0  ;;  %v4748_v52 = vsub.f32 %v4720_v11, %v5838_v39  ;;  %v4753_v53 = vsub.f32 %v4723_v16, %v5836_v40  ;;  %v5835_v54 = vand.u32 4294901760, %v4739_v48  ;;  %v306_v40 = vld [vmem:[%s4591_s19 + $0xd0] sm:$0xff] }
  0x2d   : > { %v5823_v56 = vand.u32 4294901760, %v4731_v46  ;;  %v5825_v57 = vand.u32 4294901760, %v4736_v47  ;;  %v5833_v58 = vand.u32 4294901760, %v4742_v49  ;;  %v4760_v59 = vsel %vm340_vm0, %v286_v42, 0 }
  0x2e   : > { %5903 = vst [vmem:[#allocation8_spill] sm:$0xff] %v4760_v59  ;;  %v5829_v62 = vand.u32 4294901760, %v4748_v52  ;;  %v5831_v63 = vand.u32 4294901760, %v4753_v53  ;;  %v4767_v0 = vsub.f32 %v4739_v48, %v5835_v54  ;;  %v4770_v3 = vsel %vm340_vm0, %v287_v50, 0 }
  0x2f   : > { %5904 = vst [vmem:[#allocation9_spill] sm:$0xff] %v4770_v3  ;;  %v734_v4 = vsub.f32 %v4731_v46, %v5823_v56  ;;  %v741_v5 = vsub.f32 %v4736_v47, %v5825_v57  ;;  %v4781_v17 = vsub.f32 %v4742_v49, %v5833_v58  ;;  %v5834_v38 = vand.u32 4294901760, %v4760_v59  ;;  %v304_v57 = vld [vmem:[%s4591_s19 + $0xc0] sm:$0xff] }
  0x30   : > { %v622_v42 = vsub.f32 %v4748_v52, %v5829_v62  ;;  %v629_v50 = vsub.f32 %v4753_v53, %v5831_v63  ;;  %v5837_v56 = vand.u32 4294901760, %v4767_v0  ;;  %v5841_v55 = vand.u32 4294901760, %v4770_v3 }
  0x31   : > { %v735_v44 = vand.u32 4294901760, %v734_v4  ;;  %v742_v43 = vand.u32 4294901760, %v741_v5  ;;  %v5840_v41 = vand.u32 4294901760, %v4781_v17  ;;  %v4797_v62 = vsub.f32 %v4760_v59, %v5834_v38 }
  0x32   : > { %3878 = vmatpush3.bf16.xpose.msra.mxu0 %v3877_v51  ;;  %v623_v63 = vand.u32 4294901760, %v622_v42  ;;  %v630_v32 = vand.u32 4294901760, %v629_v50  ;;  %v748_v58 = vsub.f32 %v4767_v0, %v5837_v56  ;;  %v4806_v4 = vsub.f32 %v4770_v3, %v5841_v55  ;;  %v288_v42 = vld [vmem:[%s4591_s19 + $0x40] sm:$0xff]  ;;  %v289_v50 = vld [vmem:[%s4591_s19 + $0x48] sm:$0xff] }
  0x33   : > { %v3879_v5 = vpack.c.bf16 %v742_v43, %v735_v44  ;;  %v755_v38 = vsub.f32 %v4781_v17, %v5840_v41  ;;  %v5843_v54 = vand.u32 4294901760, %v4797_v62  ;;  %v4813_v51 = vsel %vm340_vm0, %v304_v57, 0 }
  0x34   : > { %5905 = vst [vmem:[#allocation10_spill] sm:$0xff] %v4813_v51  ;;  %v3881_v56 = vpack.c.bf16 %v630_v32, %v623_v63  ;;  %v749_v39 = vand.u32 4294901760, %v748_v58  ;;  %v5844_v31 = vand.u32 4294901760, %v4806_v4  ;;  %v4820_v43 = vsel %vm340_vm0, %v305_v34, 0 }
  0x35   : > { %5906 = vst [vmem:[#allocation11_spill] sm:$0xff] %v4820_v43  ;;  %3880 = vmatprep.subr.bf16.mxu0 %v3879_v5  ;;  %v756_v44 = vand.u32 4294901760, %v755_v38  ;;  %v636_v41 = vsub.f32 %v4797_v62, %v5843_v54  ;;  %v5847_v57 = vand.u32 4294901760, %v4813_v51  ;;  %v5848_v55 = vand.u32 4294901760, %v4820_v43 }
  0x36   : > { %v643_v32 = vsub.f32 %v4806_v4, %v5844_v31  ;;  %v4832_v58 = vsel %vm340_vm0, %v288_v42, 0  ;;  %v4835_v34 = vsel %vm340_vm0, %v289_v50, 0  ;;  %v4838_v63 = vsel %vm340_vm0, %v306_v40, 0  ;;  %v290_v42 = vld [vmem:[%s4591_s19 + $0x50] sm:$0xff] }
  0x37   : > { %5907 = vst [vmem:[#allocation12_spill] sm:$0xff] %v4832_v58  ;;  %5908 = vst [vmem:[#allocation13_spill] sm:$0xff] %v4835_v34  ;;  %v3883_v38 = vpack.c.bf16 %v756_v44, %v749_v39  ;;  %v637_v5 = vand.u32 4294901760, %v636_v41  ;;  %v4843_v54 = vsub.f32 %v4813_v51, %v5847_v57  ;;  %v4848_v31 = vsub.f32 %v4820_v43, %v5848_v55  ;;  %v291_v55 = vld [vmem:[%s4591_s19 + $0x58] sm:$0xff] }
  0x38   : > { %5909 = vst [vmem:[#allocation14_spill] sm:$0xff] %v4838_v63  ;;  %v644_v10 = vand.u32 4294901760, %v643_v32  ;;  %v5855_v50 = vand.u32 4294901760, %v4832_v58  ;;  %v5854_v8 = vand.u32 4294901760, %v4835_v34  ;;  %v4854_v40 = vsel %vm340_vm0, %v307_v30, 0 }
  0x39   : > { %5910 = vst [vmem:[#allocation15_spill] sm:$0xff] %v4854_v40  ;;  %v5852_v41 = vand.u32 4294901760, %v4843_v54  ;;  %v5853_v39 = vand.u32 4294901760, %v4848_v31  ;;  %v5857_v44 = vand.u32 4294901760, %v4838_v63  ;;  %v5859_v57 = vand.u32 4294901760, %v4854_v40 }
  0x3a   : > { %3882 = vmatpush3.bf16.xpose.msra.mxu0 %v3881_v56  ;;  %v3885_v36 = vpack.c.bf16 %v644_v10, %v637_v5  ;;  %v4864_v32 = vsub.f32 %v4832_v58, %v5855_v50  ;;  %v4869_v30 = vsub.f32 %v4835_v34, %v5854_v8  ;;  %v4872_v29 = vsel %vm340_vm0, %v290_v42, 0  ;;  %v308_v8 = vld [vmem:[%s4591_s19 + $0xe0] sm:$0xff] }
  0x3b   : > { %5911 = vst [vmem:[#allocation16_spill] sm:$0xff] %v4872_v29  ;;  %3884 = vmatprep.subr.bf16.mxu0 %v3883_v38  ;;  %v762_v27 = vsub.f32 %v4843_v54, %v5852_v41  ;;  %v769_v10 = vsub.f32 %v4848_v31, %v5853_v39  ;;  %v4883_v56 = vsub.f32 %v4838_v63, %v5857_v44  ;;  %v4893_v41 = vsel %vm340_vm0, %v291_v55, 0 }
  0x3c   : > { %v4888_v5 = vsub.f32 %v4854_v40, %v5859_v57  ;;  %v5863_v38 = vand.u32 4294901760, %v4864_v32  ;;  %v5864_v42 = vand.u32 4294901760, %v4869_v30  ;;  %5912 = vst [vmem:[#allocation17_spill] sm:$0xff] %v4893_v41  ;;  %v5866_v39 = vand.u32 4294901760, %v4872_v29 }
  0x3d   : > { %v763_v50 = vand.u32 4294901760, %v762_v27  ;;  %v770_v25 = vand.u32 4294901760, %v769_v10  ;;  %v5868_v44 = vand.u32 4294901760, %v4883_v56  ;;  %v309_v10 = vld [vmem:[%s4591_s19 + $0xe8] sm:$0xff] }
  0x3e   : > { %v5872_v18 = vand.u32 4294901760, %v4888_v5  ;;  %v650_v57 = vsub.f32 %v4864_v32, %v5863_v38  ;;  %v657_v55 = vsub.f32 %v4869_v30, %v5864_v42  ;;  %v4909_v27 = vsub.f32 %v4872_v29, %v5866_v39  ;;  %v311_v39 = vld [vmem:[%s4591_s19 + $0xf8] sm:$0xff] }
  0x3f   : > { %v3887_v13 = vpack.c.bf16 %v770_v25, %v763_v50  ;;  %v776_v12 = vsub.f32 %v4883_v56, %v5868_v44  ;;  %v4919_v42 = vsel %vm340_vm0, %v308_v8, 0  ;;  %v5914_v29 = vand.u32 4294901760, %v4893_v41  ;;  %v292_v50 = vld [vmem:[%s4591_s19 + $0x60] sm:$0xff]  ;;  %v293_v44 = vld [vmem:[%s4591_s19 + $0x68] sm:$0xff] }
  0x40   : > { %v783_v38 = vsub.f32 %v4888_v5, %v5872_v18  ;;  %5913 = vst [vmem:[#allocation18_spill] sm:$0xff] %v4919_v42  ;;  %v651_v15 = vand.u32 4294901760, %v650_v57  ;;  %v658_v40 = vand.u32 4294901760, %v657_v55  ;;  %v4930_v58 = vsel %vm340_vm0, %v309_v10, 0  ;;  %v310_v18 = vld [vmem:[%s4591_s19 + $0xf0] sm:$0xff] }
  0x41   : > { %v4925_v25 = vsub.f32 %v4893_v41, %v5914_v29  ;;  %v777_v63 = vand.u32 4294901760, %v776_v12  ;;  %5915 = vst [vmem:[#allocation19_spill] sm:$0xff] %v4930_v58  ;;  %v5873_v8 = vand.u32 4294901760, %v4919_v42  ;;  %v4946_v10 = vsel %vm340_vm0, %v293_v44, 0 }
  0x42   : > { %v784_v34 = vand.u32 4294901760, %v783_v38  ;;  %3886 = vmatpush3.bf16.xpose.msra.mxu0 %v3885_v36  ;;  %v3889_v29 = vpack.c.bf16 %v658_v40, %v651_v15  ;;  %v4943_v38 = vsel %vm340_vm0, %v292_v50, 0  ;;  %5917 = vst [vmem:[#allocation21_spill] sm:$0xff] %v4946_v10  ;;  %v5918_v57 = vand.u32 4294901760, %v4909_v27  ;;  %v295_v50 = vld [vmem:[%s4591_s19 + $0x78] sm:$0xff] }
  0x43   : > { %3888 = vmatprep.subr.bf16.mxu0 %v3887_v13  ;;  %v4940_v12 = vsub.f32 %v4919_v42, %v5873_v8  ;;  %5916 = vst [vmem:[#allocation20_spill] sm:$0xff] %v4943_v38  ;;  %v5919_v13 = vand.u32 4294901760, %v4930_v58  ;;  %v5878_v40 = vand.u32 4294901760, %v4943_v38  ;;  %v294_v8 = vld [vmem:[%s4591_s19 + $0x70] sm:$0xff]  ;;  %v4961_v44 = vsel %vm340_vm0, %v310_v18, 0 }
  0x44   : > { %v3891_v36 = vpack.c.bf16 %v784_v34, %v777_v63  ;;  %v664_v55 = vsub.f32 %v4909_v27, %v5918_v57  ;;  %5920 = vst [vmem:[#allocation22_spill] sm:$0xff] %v4961_v44  ;;  %v4964_v34 = vsel %vm340_vm0, %v311_v39, 0  ;;  %v5922_v63 = vand.u32 4294901760, %v4925_v25 }
  0x45   : > { %v4954_v15 = vsub.f32 %v4930_v58, %v5919_v13  ;;  %5921 = vst [vmem:[#allocation23_spill] sm:$0xff] %v4964_v34  ;;  %v4973_v58 = vsub.f32 %v4943_v38, %v5878_v40  ;;  %v5923_v18 = vand.u32 4294901760, %v4940_v12  ;;  %v5924_v39 = vand.u32 4294901760, %v4946_v10 }
  0x46   : > { %v671_v57 = vsub.f32 %v4925_v25, %v5922_v63  ;;  %v5885_v63 = vand.u32 4294901760, %v4964_v34  ;;  %v4987_v13 = vsel %vm340_vm0, %v294_v8, 0  ;;  %v5927_v43 = vand.u32 4294901760, %v4961_v44 }
  0x47   : > { %v790_v41 = vsub.f32 %v4940_v12, %v5923_v18  ;;  %v4983_v1 = vsub.f32 %v4946_v10, %v5924_v39  ;;  %5925 = vst [vmem:[#allocation24_spill] sm:$0xff] %v4987_v13  ;;  %v5926_v40 = vand.u32 4294901760, %v4954_v15  ;;  %v665_v51 = vand.u32 4294901760, %v664_v55 }
  0x48   : > { %v4996_v18 = vsub.f32 %v4961_v44, %v5927_v43  ;;  %v5002_v10 = vsub.f32 %v4964_v34, %v5885_v63  ;;  %v5005_v8 = vsel %vm340_vm0, %v295_v50, 0  ;;  %v5888_v59 = vand.u32 4294901760, %v4987_v13 }
  0x49   : > { %v797_v38 = vsub.f32 %v4954_v15, %v5926_v40  ;;  %v672_v40 = vand.u32 4294901760, %v671_v57  ;;  %v791_v3 = vand.u32 4294901760, %v790_v41  ;;  %v5890_v39 = vand.u32 4294901760, %v5005_v8 }
  0x4a   : > { %3890 = vmatpush3.bf16.xpose.msra.mxu0 %v3889_v29  ;;  %v3903_v63 = vpack.c.bf16 %v4634_v23, %v4629_v22  ;;  %v5928_v34 = vand.u32 4294901760, %v4973_v58  ;;  %v5929_v29 = vand.u32 4294901760, %v4983_v1  ;;  %v5930_v44 = vand.u32 4294901760, %v4996_v18 }
  0x4b   : > { %v798_v42 = vand.u32 4294901760, %v797_v38  ;;  %3892 = vmatprep.subr.bf16.mxu0 %v3891_v36  ;;  %v5022_v38 = vsub.f32 %v4987_v13, %v5888_v59  ;;  %v3905_v36 = vpack.c.bf16 %v4645_v26, %v4639_v24  ;;  %v3893_v57 = vpack.c.bf16 %v672_v40, %v665_v51 }
  0x4c   : > { %v678_v50 = vsub.f32 %v4973_v58, %v5928_v34  ;;  %v685_v41 = vsub.f32 %v4983_v1, %v5929_v29  ;;  %v5029_v55 = vsub.f32 %v5005_v8, %v5890_v39  ;;  %v3907_v34 = vpack.c.bf16 %v4664_v35, %v4658_v33 }
  0x4d   : > { %v3895_v43 = vpack.c.bf16 %v798_v42, %v791_v3  ;;  %v804_v59 = vsub.f32 %v4996_v18, %v5930_v44  ;;  %v5931_v13 = vand.u32 4294901760, %v5002_v10  ;;  %v5893_v44 = vand.u32 4294901760, %v5022_v38 }
  0x4e   : > { %v679_v39 = vand.u32 4294901760, %v678_v50  ;;  %v686_v42 = vand.u32 4294901760, %v685_v41  ;;  %v5932_v26 = vand.u32 4294901760, %v4597_v6  ;;  %v5933_v50 = vand.u32 4294901760, %v4600_v7 }
  0x4f   : > { %v811_v51 = vsub.f32 %v5002_v10, %v5931_v13  ;;  %v805_v3 = vand.u32 4294901760, %v804_v59  ;;  %v5934_v41 = vand.u32 4294901760, %v4604_v9  ;;  %v5935_v59 = vand.u32 4294901760, %v4611_v14 }
  0x50   : > { %v5071_v35 = vpack.c.bf16 %v5933_v50, %v5932_v26  ;;  %v5936_v29 = vand.u32 4294901760, %v5029_v55  ;;  %v5937_v6 = vand.u32 4294901760, %v4618_v19  ;;  %v5938_v7 = vand.u32 4294901760, %v4621_v20 }
  0x51   : > { %v812_v40 = vand.u32 4294901760, %v811_v51  ;;  %v3897_v51 = vpack.c.bf16 %v686_v42, %v679_v39  ;;  %v5939_v42 = vand.u32 4294901760, %v4624_v21  ;;  %v5941_v50 = vand.u32 4294901760, %v4707_v60 }
  0x52   : > { %3894 = vmatpush3.bf16.xpose.msra.mxu0 %v3893_v57  ;;  %v692_v57 = vsub.f32 %v5022_v38, %v5893_v44  ;;  %v699_v13 = vsub.f32 %v5029_v55, %v5936_v29  ;;  %v5089_v26 = vpack.c.bf16 %v5938_v7, %v5937_v6  ;;  %3840 = vmatprep.subr.bf16.mxu1 %v5071_v35  ;;  %v5940_v29 = vand.u32 4294901760, %v4649_v28 }
  0x53   : > { %3896 = vmatprep.subr.bf16.mxu0 %v3895_v43  ;;  %v5077_v43 = vpack.c.bf16 %v5935_v59, %v5934_v41  ;;  %v3899_v9 = vpack.c.bf16 %v812_v40, %v805_v3  ;;  %v5942_v41 = vand.u32 4294901760, %v4710_v61  ;;  %v313_v3 = vld [vmem:[%s5816_s1 + $0x8] sm:$0xff]  ;;  %v5943_v21 = vand.u32 4294901760, %v4629_v22  ;;  %v314_v61 = vld [vmem:[%s5816_s1 + $0x10] sm:$0xff] }
  0x54   : > { %v693_v14 = vand.u32 4294901760, %v692_v57  ;;  %v700_v39 = vand.u32 4294901760, %v699_v13  ;;  %v5098_v19 = vpack.c.bf16 %v5940_v29, %v5939_v42  ;;  %v5944_v28 = vand.u32 4294901760, %v4634_v23 }
  0x55   : > { %3842 = vmatpush3.bf16.xpose.msra.mxu1 %v5077_v43  ;;  %v5104_v40 = vpack.c.bf16 %v5942_v41, %v5941_v50  ;;  %v345_v60 = vsel %vm340_vm0, %v313_v3, 0  ;;  %v5945_v57 = vand.u32 4294901760, %v4720_v11  ;;  %v5946_v59 = vand.u32 4294901760, %v4723_v16  ;;  %v315_v11 = vld [vmem:[%s5816_s1 + $0x18] sm:$0xff] }
  0x56   : > { %3844 = vmatprep.subr.bf16.mxu1 %v5089_v26  ;;  %v3901_v20 = vpack.c.bf16 %v700_v39, %v693_v14  ;;  %v5115_v13 = vpack.c.bf16 %v5944_v28, %v5943_v21  ;;  %v5127_v6 = vand.u32 4294901760, %v345_v60  ;;  %v5947_v22 = vand.u32 4294901760, %v4739_v48  ;;  %v5951_v14 = vld [vmem:[#allocation9_spill] sm:$0xff]  ;;  %v5955_v50 = vld [vmem:[#allocation11_spill] sm:$0xff] }
  0x57   : > { %v5948_v23 = vand.u32 4294901760, %v4742_v49  ;;  %v351_v48 = vsel %vm340_vm0, %v315_v11, 0  ;;  %v5949_v49 = vld [vmem:[#allocation8_spill] sm:$0xff]  ;;  %v5952_v39 = vand.u32 4294901760, %v5951_v14  ;;  %v5956_v41 = vand.u32 4294901760, %v5955_v50  ;;  %v5958_v21 = vld [vmem:[#allocation5_spill] sm:$0xff] }
  0x58   : > { %v5154_v29 = vand.u32 4294901760, %v351_v48  ;;  %v547_v28 = vsub.f32 %v5958_v21, %v4585_v2  ;;  %v5966_v14 = vld [vmem:[#allocation15_spill] sm:$0xff]  ;;  %v5969_v50 = vpack.c.bf16 %v4781_v17, %v4767_v0  ;;  %v5972_v21 = vld [vmem:[#allocation17_spill] sm:$0xff] }
  0x59   : > { %v5133_v7 = vpack.c.bf16 %v5948_v23, %v5947_v22  ;;  %v5962_v22 = vld [vmem:[#allocation13_spill] sm:$0xff] }
  0x5a   : > { %3898 = vmatpush3.bf16.xpose.msra.mxu0 %v3897_v51  ;;  %v5125_v51 = vpack.c.bf16 %v5946_v59, %v5945_v57  ;;  %v5960_v57 = vld [vmem:[#allocation12_spill] sm:$0xff]  ;;  %v5963_v23 = vand.u32 4294901760, %v5962_v22 }
  0x5b   : > { %3900 = vmatprep.subr.bf16.mxu0 %v3899_v9  ;;  %v5950_v9 = vand.u32 4294901760, %v5949_v49  ;;  %v5961_v59 = vand.u32 4294901760, %v5960_v57  ;;  %v5964_v49 = vld [vmem:[#allocation14_spill] sm:$0xff] }
  0x5d   : > { %3846 = vmatpush3.bf16.xpose.msra.mxu1 %v5098_v19  ;;  %v5151_v42 = vpack.c.bf16 %v5952_v39, %v5950_v9  ;;  %v5179_v11 = vpack.c.bf16 %v5963_v23, %v5961_v59  ;;  %v5965_v9 = vand.u32 4294901760, %v5964_v49  ;;  %v5967_v39 = vand.u32 4294901760, %v5966_v14  ;;  %v5974_v59 = vld [vmem:[#allocation18_spill] sm:$0xff]  ;;  %v5976_v23 = vld [vmem:[#allocation19_spill] sm:$0xff] }
  0x5e   : > { %3848 = vmatprep.subr.bf16.mxu1 %v5104_v40  ;;  %v5975_v22 = vand.u32 4294901760, %v5974_v59  ;;  %v5977_v49 = vand.u32 4294901760, %v5976_v23  ;;  %v5979_v14 = vpack.c.bf16 %v4806_v4, %v4797_v62 }
  0x62   : > { %3902 = vmatpush3.bf16.xpose.msra.mxu0 %v3901_v20 }
  0x63   : > { %3904 = vmatprep.subr.bf16.mxu0 %v3903_v63  ;;  %v348_v63 = vsel %vm340_vm0, %v314_v61, 0  ;;  %v5959_v61 = vpack.c.bf16 %v4736_v47, %v4731_v46 }
  0x64   : > { %v5143_v16 = vand.u32 4294901760, %v348_v63 }
  0x65   : > { %3850 = vmatpush3.bf16.xpose.msra.mxu1 %v5125_v51 }
  0x66   : > { %3852 = vmatprep.subr.bf16.mxu1 %v5133_v7 }
  0x69   : > { %3672 = vmatmul.mubr.f32.vlgmr.msra.gmra.mrb[0].mxu0 %v4585_v2 }
  0x6a   : > { %3906 = vmatpush3.bf16.xpose.msra.mxu0 %v3905_v36  ;;  %3673 = vmatprep.mubr.f32.mxu0 %v5127_v6  ;;  %v5953_v36 = vld [vmem:[#allocation10_spill] sm:$0xff] }
  0x6b   : > { %3908 = vmatprep.subr.bf16.mxu0 %v3907_v34  ;;  %v5954_v20 = vand.u32 4294901760, %v5953_v36  ;;  %v5957_v34 = vpack.c.bf16 %v4690_v45, %v4670_v37  ;;  %v5185_v36 = vpack.c.bf16 %v5967_v39, %v5965_v9  ;;  %v5205_v9 = vpack.c.bf16 %v5977_v49, %v5975_v22  ;;  %v5988_v22 = vld [vmem:[#allocation23_spill] sm:$0xff] }
  0x6c   : > { %v5980_v39 = vpack.c.bf16 %v4848_v31, %v4843_v54  ;;  %v5989_v23 = vand.u32 4294901760, %v5988_v22  ;;  %v5999_v22 = vpack.c.bf16 %v4983_v1, %v4973_v58 }
  0x6d   : > { %3674 = vmatmul.mubr.f32.gmra.mrb[2].mxu0 %v5127_v6  ;;  %v5160_v3 = vpack.c.bf16 %v5956_v41, %v5954_v20  ;;  %3854 = vmatpush3.bf16.xpose.msra.mxu1 %v5151_v42  ;;  %v5968_v20 = vpack.c.bf16 %v4753_v53, %v4748_v52  ;;  %v5970_v41 = vld [vmem:[#allocation16_spill] sm:$0xff]  ;;  %5978 = vst [vmem:[#allocation8_spill] sm:$0xff] %v5205_v9 }
  0x6e   : > { %3675 = vmatprep.mubr.f32.mxu0 %v5143_v16 }
  0x6f   : > { %3856 = vmatprep.subr.bf16.mxu1 %v5160_v3 }
  0x71   : > { %3676 = vmatmul.mubr.f32.gmra.mrb[4].mxu0 %v5143_v16 }
  0x72   : > { %3910 = vmatpush3.bf16.xpose.msra.mxu0 %v5957_v34  ;;  %3677 = vmatprep.mubr.f32.mxu0 %v5154_v29  ;;  %v5971_v34 = vand.u32 4294901760, %v5970_v41  ;;  %v5983_v41 = vld [vmem:[#allocation21_spill] sm:$0xff] }
  0x73   : > { %3912 = vmatprep.subr.bf16.mxu0 %v5959_v61  ;;  %v5973_v61 = vand.u32 4294901760, %v5972_v21 }
  0x75   : > { %3678 = vmatmul.mubr.f32.gmra.mrb[6].mxu0 %v5154_v29  ;;  %3858 = vmatpush3.bf16.xpose.msra.mxu1 %v5179_v11  ;;  %v5199_v57 = vpack.c.bf16 %v5973_v61, %v5971_v34  ;;  %v5984_v34 = vand.u32 4294901760, %v5983_v41  ;;  %v5986_v61 = vld [vmem:[#allocation22_spill] sm:$0xff]  ;;  %v5995_v41 = vand.u32 4294901760, %v5005_v8  ;;  %v6001_v8 = vpack.c.bf16 %v5029_v55, %v5022_v38 }
  0x76   : > { %3711 = vmatprep.mubr.f32.mxu0 %v547_v28  ;;  %3860 = vmatprep.subr.bf16.mxu1 %v5185_v36  ;;  %v5987_v59 = vand.u32 4294901760, %v5986_v61  ;;  %v5997_v61 = vpack.c.bf16 %v4925_v25, %v4909_v27 }
  0x78   : > { %v5225_v49 = vpack.c.bf16 %v5989_v23, %v5987_v59  ;;  %v5998_v59 = vpack.c.bf16 %v4954_v15, %v4940_v12  ;;  %v6000_v23 = vpack.c.bf16 %v5002_v10, %v4996_v18 }
  0x7a   : > { %3914 = vmatpush3.bf16.xpose.msra.mxu0 %v5968_v20  ;;  %v5981_v20 = vld [vmem:[#allocation20_spill] sm:$0xff]  ;;  %5990 = vst [vmem:[#allocation10_spill] sm:$0xff] %v5225_v49 }
  0x7b   : > { %3916 = vmatprep.subr.bf16.mxu0 %v5969_v50  ;;  %v5982_v50 = vand.u32 4294901760, %v5981_v20  ;;  %v5993_v20 = vld [vmem:[#allocation24_spill] sm:$0xff] }
  0x7d   : > { %3862 = vmatpush3.bf16.xpose.msra.mxu1 %v5199_v57  ;;  %v5219_v21 = vpack.c.bf16 %v5984_v34, %v5982_v50  ;;  %v5994_v50 = vand.u32 4294901760, %v5993_v20  ;;  %v580_v20 = vsub.f32 %v351_v48, %v5154_v29 }
  0x7e   : > { %3864 = vmatprep.subr.bf16.mxu1 %v5205_v9 }
  0x7f   : > { %5985 = vst [vmem:[#allocation9_spill] sm:$0xff] %v5219_v21  ;;  %v5239_v34 = vpack.c.bf16 %v5995_v41, %v5994_v50  ;;  %v548_v50 = vand.u32 4294901760, %v547_v28 }
  0x81   : > { %5996 = vst [vmem:[#allocation11_spill] sm:$0xff] %v5239_v34 }
  0x82   : > { %3918 = vmatpush3.bf16.xpose.msra.mxu0 %v5979_v14  ;;  %v5991_v14 = vpack.c.bf16 %v4869_v30, %v4864_v32 }
  0x83   : > { %3920 = vmatprep.subr.bf16.mxu0 %v5980_v39  ;;  %v5992_v39 = vpack.c.bf16 %v4888_v5, %v4883_v56 }
  0x85   : > { %3866 = vmatpush3.bf16.xpose.msra.mxu1 %v5219_v21 }
  0x86   : > { %3868 = vmatprep.subr.bf16.mxu1 %v5225_v49 }
  0x8a   : > { %3922 = vmatpush3.bf16.xpose.msra.mxu0 %v5991_v14  ;;  %v558_v14 = vsub.f32 %v345_v60, %v5127_v6  ;;  %v549_v60 = vsub.f32 %v547_v28, %v548_v50 }
  0x8b   : > { %3924 = vmatprep.subr.bf16.mxu0 %v5992_v39  ;;  %v569_v39 = vsub.f32 %v348_v63, %v5143_v16 }
  0x8c   : > { %v550_v63 = vand.u32 4294901760, %v549_v60  ;;  %v559_v48 = vand.u32 4294901760, %v558_v14  ;;  %v6006_v60 = vld [vmem:[#allocation7_spill] sm:$0xff] }
  0x8d   : > { %3870 = vmatpush3.bf16.xpose.msra.mxu1 %v5239_v34 }
  0x8e   : > { %3631 = vmatprep.mubr.f32.mxu1 %v550_v63  ;;  %v560_v41 = vsub.f32 %v558_v14, %v559_v48 }
  0x92   : > { %3926 = vmatpush3.bf16.xpose.msra.mxu0 %v5997_v61  ;;  %v570_v61 = vand.u32 4294901760, %v569_v39 }
  0x93   : > { %3928 = vmatprep.subr.bf16.mxu0 %v5998_v59  ;;  %v561_v59 = vand.u32 4294901760, %v560_v41  ;;  %v6016_v41 = vand.u32 4294901760, %v4797_v62  ;;  %v6020_v62 = vand.u32 4294901760, %v4864_v32  ;;  %v2939_v32 = vld [vmem:[%s5821_s6] sm:$0x3] }
  0x94   : > { %3632 = vmatmul.mubr.f32.vlgmr.msra.gmra.mrb[0].mxu1 %v550_v63  ;;  %v581_v63 = vand.u32 4294901760, %v580_v20 }
  0x95   : > { %3633 = vmatprep.mubr.f32.mxu1 %v561_v59 }
  0x98   : > { %3634 = vmatmul.mubr.f32.gmra.mrb[2].mxu1 %v561_v59 }
  0x9a   : > { %3930 = vmatpush3.bf16.xpose.msra.mxu0 %v5999_v22  ;;  %v6002_v22 = vand.u32 4294901760, %v4639_v24 }
  0x9b   : > { %3932 = vmatprep.subr.bf16.mxu0 %v6000_v23  ;;  %v6003_v23 = vld [vmem:[#allocation6_spill] sm:$0xff] }
  0xa2   : > { %3934 = vmatpush3.bf16.xpose.msra.mxu0 %v6001_v8  ;;  %v6004_v8 = vand.u32 4294901760, %v6003_v23  ;;  %v6019_v23 = vand.u32 4294901760, %v4848_v31  ;;  %v3589_v31 = vld [vmem:[%s5819_s4 + $0x28] sm:$0xff] }
  0xa3   : > { %3936 = vmatprep.subr.bf16.mxu0 %v5071_v35 }
  0xa4   : > { %v3969_v44 = vpack.c.bf16 %v6004_v8, %v6002_v22  ;;  %v6018_v22 = vand.u32 4294901760, %v4843_v54  ;;  %v3588_v54 = vld [vmem:[%s5819_s4 + $0x20] sm:$0xff] }
  0xa6   : > { %v3983_v8 = vpack.c.bf16 %v6019_v23, %v6018_v22 }
  0xa9   : > { %3712 = vmatmul.mubr.f32.vlgmr.msra.gmra.mrb[0].mxu0 %v547_v28  ;;  %v6005_v28 = vand.u32 4294901760, %v4658_v33 }
  0xaa   : > { %3938 = vmatpush3.bf16.xpose.msra.mxu0 %v5077_v43  ;;  %3713 = vmatprep.mubr.f32.mxu0 %v558_v14 }
  0xab   : > { %3940 = vmatprep.subr.bf16.mxu0 %v5089_v26 }
  0xad   : > { %3714 = vmatmul.mubr.f32.gmra.mrb[2].mxu0 %v558_v14  ;;  %v6008_v14 = vand.u32 4294901760, %v4670_v37  ;;  %v316_v37 = vld [vmem:[%s5817_s2] sm:$0xff] }
  0xae   : > { %3715 = vmatprep.mubr.f32.mxu0 %v569_v39 }
  0xb1   : > { %3716 = vmatmul.mubr.f32.gmra.mrb[4].mxu0 %v569_v39 }
  0xb2   : > { %3942 = vmatpush3.bf16.xpose.msra.mxu0 %v5098_v19  ;;  %3717 = vmatprep.mubr.f32.mxu0 %v580_v20 }
  0xb3   : > { %3944 = vmatprep.subr.bf16.mxu0 %v5104_v40 }
  0xb5   : > { %3718 = vmatmul.mubr.f32.gmra.mrb[6].mxu0 %v580_v20 }
  0xb6   : > { %3751 = vmatprep.mubr.f32.mxu0 %v548_v50 }
  0xba   : > { %3946 = vmatpush3.bf16.xpose.msra.mxu0 %v5125_v51 }
  0xbb   : > { %3948 = vmatprep.subr.bf16.mxu0 %v5133_v7 }
  0xc2   : > { %3950 = vmatpush3.bf16.xpose.msra.mxu0 %v5151_v42 }
  0xc3   : > { %3952 = vmatprep.subr.bf16.mxu0 %v5160_v3 }
  0xca   : > { %3954 = vmatpush3.bf16.xpose.msra.mxu0 %v5179_v11 }
  0xcb   : > { %3956 = vmatprep.subr.bf16.mxu0 %v5185_v36 }
  0xd2   : > { %3958 = vmatpush3.bf16.xpose.msra.mxu0 %v5199_v57 }
  0xd3   : > { %3960 = vmatprep.subr.bf16.mxu0 %v5205_v9 }
  0xda   : > { %3962 = vmatpush3.bf16.xpose.msra.mxu0 %v5219_v21  ;;  %v571_v21 = vsub.f32 %v569_v39, %v570_v61  ;;  %v6009_v39 = vand.u32 4294901760, %v4690_v45  ;;  %v6012_v45 = vand.u32 4294901760, %v4748_v52  ;;  %v317_v52 = vld [vmem:[%s5817_s2 + $0x8] sm:$0xff] }
  0xdb   : > { %3964 = vmatprep.subr.bf16.mxu0 %v5225_v49  ;;  %v6007_v49 = vand.u32 4294901760, %v6006_v60  ;;  %v1466_v60 = vld [vmem:[%s5819_s4 + $0x18] sm:$0xff] }
  0xdc   : > { %v3973_v33 = vpack.c.bf16 %v6009_v39, %v6008_v14  ;;  %v3590_v39 = vld [vmem:[%s5819_s4 + $0x30] sm:$0xff] }
  0xdd   : > { %v3971_v9 = vpack.c.bf16 %v6007_v49, %v6005_v28  ;;  %v6010_v49 = vand.u32 4294901760, %v4731_v46  ;;  %v4486_v46 = vmov 0   ;;  %v1465_v28 = vld [vmem:[%s5819_s4 + $0x10] sm:$0xff] }
  0xde   : > { %4372 = vset.pattern.permute.xlu0 %v4486_v46  ;;  %4373 = vset.pattern.permute.xlu1 %v4486_v46 }
  0xdf   : > { %322 = vperm.xlu0 %4372, %v316_v37   ;;  %v6028_v37 = vand.u32 4294901760, %v4973_v58  ;;  %v6036_v58 = vld [vmem:[#allocation10_spill] sm:$0xff] }
  0xe2   : > { %3966 = vmatpush3.bf16.xpose.msra.mxu0 %v5239_v34  ;;  %v572_v34 = vand.u32 4294901760, %v571_v21  ;;  %v6011_v21 = vand.u32 4294901760, %v4736_v47  ;;  %v318_v47 = vld [vmem:[%s5817_s2 + $0x10] sm:$0xff] }
  0xe3   : > { %3968 = vmatprep.subr.bf16.mxu0 %v5115_v13  ;;  %v582_v13 = vsub.f32 %v580_v20, %v581_v63  ;;  %v6015_v20 = vand.u32 4294901760, %v4781_v17  ;;  %332 = vperm.xlu1 %4373, %v318_v47   ;;  %v1464_v17 = vld [vmem:[%s5819_s4 + $0x8] sm:$0xff] }
  0xe4   : > { %3635 = vmatprep.mubr.f32.mxu1 %v572_v34  ;;  %327 = vperm.xlu0 %4372, %v317_v52  }
  0xe5   : > { %3636 = vmatmul.mubr.f32.gmra.mrb[4].mxu1 %v572_v34  ;;  %v583_v24 = vand.u32 4294901760, %v582_v13  ;;  %v6014_v34 = vand.u32 4294901760, %v4767_v0  ;;  %v1463_v0 = vld [vmem:[%s5819_s4] sm:$0xff]  ;;  %v6022_v13 = vand.u32 4294901760, %v4883_v56  ;;  %v6025_v56 = vand.u32 4294901760, %v4925_v25 }
  0xe6   : > { %v6032_v25 = vand.u32 4294901760, %v5022_v38 }
  0xe7   : > { %3637 = vmatprep.mubr.f32.mxu1 %v583_v24 }
  0xe8   : > { %1469 = vperm.xlu0 %4372, %v1463_v0  }
  0xe9   : > { %3752 = vmatmul.mubr.f32.vlgmr.msra.gmra.mrb[0].mxu0 %v548_v50  ;;  %v3975_v50 = vpack.c.bf16 %v6011_v21, %v6010_v49  ;;  %3638 = vmatmul.mubr.f32.gmra.mrb[6].mxu1 %v583_v24  ;;  %v6023_v24 = vand.u32 4294901760, %v4888_v5  ;;  %v6026_v49 = vand.u32 4294901760, %v4940_v12  ;;  %v6027_v21 = vand.u32 4294901760, %v4954_v15 }
  0xea   : > { %3970 = vmatpush3.bf16.xpose.msra.mxu0 %v3969_v44  ;;  %3753 = vmatprep.mubr.f32.mxu0 %v559_v48  ;;  %v6013_v44 = vand.u32 4294901760, %v4753_v53  ;;  %v319_v53 = vld [vmem:[%s5817_s2 + $0x18] sm:$0xff]  ;;  %v6033_v12 = vand.u32 4294901760, %v5029_v55 }
  0xeb   : > { %3972 = vmatprep.subr.bf16.mxu0 %v3971_v9  ;;  %337 = vperm.xlu1 %4373, %v319_v53   ;;  %v3987_v14 = vpack.c.bf16 %v6023_v24, %v6022_v13 }
  0xec   : > { %v3977_v9 = vpack.c.bf16 %v6013_v44, %v6012_v45  ;;  %1479 = vperm.xlu0 %4372, %v1465_v28   ;;  %v6029_v45 = vand.u32 4294901760, %v4983_v1  ;;  %v3997_v15 = vpack.c.bf16 %v6033_v12, %v6032_v25  ;;  %v6034_v1 = vld [vmem:[#allocation8_spill] sm:$0xff]  ;;  %v1462_v12 = vld [vmem:[%s5818_s3 + $0x18] sm:$0xff] }
  0xed   : > { %3754 = vmatmul.mubr.f32.gmra.mrb[2].mxu0 %v559_v48  ;;  %v3979_v48 = vpack.c.bf16 %v6015_v20, %v6014_v34  ;;  %v1459_v34 = vld [vmem:[%s5818_s3] sm:$0xff] }
  0xee   : > { %3755 = vmatprep.mubr.f32.mxu0 %v570_v61  ;;  %v3993_v44 = vpack.c.bf16 %v6029_v45, %v6028_v37 }
  0xef   : > { %1474 = vperm.xlu1 %4373, %v1464_v17   ;;  %v1489_v17 = vsel %vm1487_vm1, %v1459_v34, 0 }
  0xf0   : > { %2210 = vperm.xlu0 %4372, %v3588_v54   ;;  %v5416_v23 = vand.u32 4294901760, %v1489_v17 }
  0xf1   : > { %3756 = vmatmul.mubr.f32.gmra.mrb[4].mxu0 %v570_v61  ;;  %v6017_v61 = vand.u32 4294901760, %v4806_v4  ;;  %v6021_v4 = vand.u32 4294901760, %v4869_v30  ;;  %v6024_v30 = vand.u32 4294901760, %v4909_v27  ;;  %v6031_v27 = vand.u32 4294901760, %v5002_v10  ;;  %v6037_v10 = vld [vmem:[#allocation11_spill] sm:$0xff] }
  0xf2   : > { %3974 = vmatpush3.bf16.xpose.msra.mxu0 %v3973_v33  ;;  %3757 = vmatprep.mubr.f32.mxu0 %v581_v63  ;;  %v3591_v33 = vld [vmem:[%s5819_s4 + $0x38] sm:$0xff]  ;;  %v5420_v13 = vsub.f32 %v1489_v17, %v5416_v23 }
  0xf3   : > { %3976 = vmatprep.subr.bf16.mxu0 %v3975_v50  ;;  %v3981_v59 = vpack.c.bf16 %v6017_v61, %v6016_v41  ;;  %1484 = vperm.xlu1 %4373, %v1466_v60   ;;  %v3989_v5 = vpack.c.bf16 %v6025_v56, %v6024_v30  ;;  %v3991_v50 = vpack.c.bf16 %v6027_v21, %v6026_v49 }
  0xf4   : > { %2220 = vperm.xlu0 %4372, %v3590_v39  }
  0xf5   : > { %3758 = vmatmul.mubr.f32.gmra.mrb[6].mxu0 %v581_v63  ;;  %v3985_v63 = vpack.c.bf16 %v6021_v4, %v6020_v62 }
  0xf6   : > { %3791 = vmatprep.mubr.f32.mxu0 %v4585_v2 }
  0xf7   : > { %2215 = vperm.xlu1 %4373, %v3589_v31  }
  0xf8   : > { %2942 = vperm.xlu0 %4372, %v2939_v32  }
  0xfa   : > { %3978 = vmatpush3.bf16.xpose.msra.mxu0 %v3977_v9  ;;  %v6030_v9 = vand.u32 4294901760, %v4996_v18 }
  0xfb   : > { %3980 = vmatprep.subr.bf16.mxu0 %v3979_v48  ;;  %2225 = vperm.xlu1 %4373, %v3591_v33  }
  0xfc   : > { %v3995_v46 = vpack.c.bf16 %v6031_v27, %v6030_v9 }
 0x102   : > { %3982 = vmatpush3.bf16.xpose.msra.mxu0 %v3981_v59  ;;  %v1460_v59 = vld [vmem:[%s5818_s3 + $0x8] sm:$0xff] }
 0x103   : > { %3984 = vmatprep.subr.bf16.mxu0 %v3983_v8  ;;  %v1492_v31 = vsel %vm1487_vm1, %v1460_v59, 0 }
 0x104   : > { %v5422_v33 = vand.u32 4294901760, %v1492_v31 }
 0x10a   : > { %3986 = vmatpush3.bf16.xpose.msra.mxu0 %v3985_v63 }
 0x10b   : > { %3988 = vmatprep.subr.bf16.mxu0 %v3987_v14 }
 0x112   : > { %3990 = vmatpush3.bf16.xpose.msra.mxu0 %v3989_v5  ;;  %v1461_v5 = vld [vmem:[%s5818_s3 + $0x10] sm:$0xff] }
 0x113   : > { %3992 = vmatprep.subr.bf16.mxu0 %v3991_v50  ;;  %v1575_v50 = vand.u32 4294901760, %v5420_v13  ;;  %v1495_v9 = vsel %vm1487_vm1, %v1461_v5, 0 }
 0x11a   : > { %3994 = vmatpush3.bf16.xpose.msra.mxu0 %v3993_v44  ;;  %v5433_v44 = vsub.f32 %v1492_v31, %v5422_v33 }
 0x11b   : > { %3996 = vmatprep.subr.bf16.mxu0 %v3995_v46 }
 0x122   : > { %3998 = vmatpush3.bf16.xpose.msra.mxu0 %v3997_v15 }
 0x123   : > { %4000 = vmatprep.subr.bf16.mxu0 %v5071_v35  ;;  %v6035_v35 = vld [vmem:[#allocation9_spill] sm:$0xff] }
 0x129   : > { %3792 = vmatmul.mubr.f32.vlgmr.msra.gmra.mrb[0].mxu0 %v4585_v2 }
 0x12a   : > { %4002 = vmatpush3.bf16.xpose.msra.mxu0 %v5077_v43  ;;  %3793 = vmatprep.mubr.f32.mxu0 %v5127_v6 }
 0x12b   : > { %4004 = vmatprep.subr.bf16.mxu0 %v5089_v26 }
 0x12d   : > { %3794 = vmatmul.mubr.f32.gmra.mrb[2].mxu0 %v5127_v6 }
 0x12e   : > { %3795 = vmatprep.mubr.f32.mxu0 %v5143_v16 }
 0x131   : > { %3796 = vmatmul.mubr.f32.gmra.mrb[4].mxu0 %v5143_v16 }
 0x132   : > { %4006 = vmatpush3.bf16.xpose.msra.mxu0 %v5098_v19  ;;  %3797 = vmatprep.mubr.f32.mxu0 %v5154_v29 }
 0x133   : > { %4008 = vmatprep.subr.bf16.mxu0 %v5104_v40 }
 0x135   : > { %3798 = vmatmul.mubr.f32.gmra.mrb[6].mxu0 %v5154_v29 }
 0x136   : > { %3831 = vmatprep.mubr.f32.mxu0 %v4585_v2 }
 0x13a   : > { %4010 = vmatpush3.bf16.xpose.msra.mxu0 %v5125_v51  ;;  %v4487_v51 = vmov 0.0  }
 0x13b   : > { %4012 = vmatprep.subr.bf16.mxu0 %v5133_v7  ;;  %1572 = vmatprep.mubr.f32.mxu1 %v4487_v51 }
 0x142   : > { %4014 = vmatpush3.bf16.xpose.msra.mxu0 %v5151_v42 }
 0x143   : > { %4016 = vmatprep.subr.bf16.mxu0 %v5160_v3 }
 0x14a   : > { %4018 = vmatpush3.bf16.xpose.msra.mxu0 %v5179_v11 }
 0x14b   : > { %4020 = vmatprep.subr.bf16.mxu0 %v5185_v36 }
 0x152   : > { %4022 = vmatpush3.bf16.xpose.msra.mxu0 %v5199_v57 }
 0x153   : > { %4024 = vmatprep.subr.bf16.mxu0 %v6034_v1 }
 0x15a   : > { %4026 = vmatpush3.bf16.xpose.msra.mxu0 %v6035_v35 }
 0x15b   : > { %4028 = vmatprep.subr.bf16.mxu0 %v6036_v58 }
 0x162   : > { %4030 = vmatpush3.bf16.xpose.msra.mxu0 %v6037_v10  ;;  %v333_v20 = vpop.permute.xlu1 %332  ;;  %v1576_v10 = vsub.f32 %v5420_v13, %v1575_v50 }
 0x167   : > { %v552_v18 = vpop.f32.mrb[0].mxu1 }
 0x168   : > { %v554_v55 = vpop.f32.mrb[1].mxu1 }
 0x169   : > { %3832 = vmatmul.mubr.f32.vlgmr.msra.gmra.mrb[0].mxu0 %v4585_v2 }
 0x16a   : > { %3833 = vmatprep.mubr.f32.mxu0 %v5127_v6  ;;  %v338_v60 = vpop.permute.xlu1 %337 }
 0x16b   : > { %v563_v38 = vpop.f32.mrb[2].mxu1 }
 0x16c   : > { %v565_v43 = vpop.f32.mrb[3].mxu1 }
 0x16d   : > { %3834 = vmatmul.mubr.f32.gmra.mrb[2].mxu0 %v5127_v6  ;;  %v323_v6 = vpop.permute.xlu0 %322 }
 0x16e   : > { %3835 = vmatprep.mubr.f32.mxu0 %v5143_v16  ;;  %v553_v7 = vadd.f32 %v552_v18, %v323_v6  ;;  %v555_v42 = vadd.f32 %v554_v55, %v323_v6  ;;  %v5448_v18 = vand.u32 4294901760, %v1495_v9 }
 0x171   : > { %3836 = vmatmul.mubr.f32.gmra.mrb[4].mxu0 %v5143_v16  ;;  %v328_v3 = vpop.permute.xlu0 %327 }
 0x172   : > { %3837 = vmatprep.mubr.f32.mxu0 %v5154_v29  ;;  %v564_v11 = vadd.f32 %v563_v38, %v328_v3 }
 0x175   : > { %3838 = vmatmul.mubr.f32.gmra.mrb[6].mxu0 %v5154_v29  ;;  %v566_v29 = vadd.f32 %v565_v43, %v328_v3 }
 0x1b8   : > { %v574_v26 = vpop.f32.mrb[4].mxu1 }
 0x1b9   : > { %v576_v19 = vpop.f32.mrb[5].mxu1  ;;  %v575_v52 = vadd.f32 %v574_v26, %v333_v20  ;;  %v1586_v26 = vand.u32 4294901760, %v5433_v44 }
 0x1ba   : > { %v577_v41 = vadd.f32 %v576_v19, %v333_v20  ;;  %v1498_v19 = vsel %vm1487_vm1, %v1462_v12, 0 }
 0x1bc   : > { %v585_v40 = vpop.f32.mrb[6].mxu1 }
 0x1bd   : > { %v587_v2 = vpop.f32.mrb[7].mxu1  ;;  %v586_v62 = vadd.f32 %v585_v40, %v338_v60 }
 0x1be   : > { %v588_v4 = vadd.f32 %v587_v2, %v338_v60 }
 0x23c   : > { %v1425_v16 = vpop.f32.mrb[0].mxu0 }
 0x23d   : > { %v4176_v36 = vadd.f32 %v1425_v16, %v553_v7  ;;  %v1427_v57 = vpop.f32.mrb[1].mxu0 }
 0x23e   : > { %v4178_v47 = vadd.f32 %v1427_v57, %v555_v42 }
 0x23f   : > { %4374 = vtanh.f32 %v4176_v36 }
 0x240   : > { %4376 = vtanh.f32 %v4178_v47  ;;  %v1432_v48 = vpop.f32.mrb[2].mxu0  ;;  %v5470_v47 = vsub.f32 %v1495_v9, %v5448_v18 }
 0x241   : > { %v4180_v53 = vadd.f32 %v1432_v48, %v564_v11  ;;  %v1434_v0 = vpop.f32.mrb[3].mxu0 }
 0x242   : > { %v4182_v61 = vadd.f32 %v1434_v0, %v566_v29  ;;  %v1597_v5 = vand.u32 4294901760, %v5470_v47 }
 0x243   : > { %4378 = vtanh.f32 %v4180_v53  ;;  %v5477_v53 = vand.u32 4294901760, %v1498_v19 }
 0x244   : > { %4380 = vtanh.f32 %v4182_v61  ;;  %v1439_v22 = vpop.f32.mrb[4].mxu0 }
 0x245   : > { %v4184_v8 = vadd.f32 %v1439_v22, %v575_v52  ;;  %v1441_v28 = vpop.f32.mrb[5].mxu0  ;;  %v5496_v9 = vsub.f32 %v1498_v19, %v5477_v53  ;;  %v1598_v19 = vsub.f32 %v5470_v47, %v1597_v5 }
 0x246   : > { %v4186_v54 = vadd.f32 %v1441_v28, %v577_v41 }
 0x247   : > { %4382 = vtanh.f32 %v4184_v8 }
 0x248   : > { %4384 = vtanh.f32 %v4186_v54  ;;  %v1446_v63 = vpop.f32.mrb[6].mxu0 }
 0x249   : > { %v4375_v24 = vpop.eup %4374  ;;  %v4188_v14 = vadd.f32 %v1446_v63, %v586_v62  ;;  %v1448_v39 = vpop.f32.mrb[7].mxu0 }
 0x24a   : > { %v4377_v32 = vpop.eup %4376  ;;  %v4190_v30 = vadd.f32 %v1448_v39, %v588_v4  ;;  %v1502_v56 = vand.u32 4294901760, %v4375_v24  ;;  %v1577_v4 = vand.u32 4294901760, %v1576_v10 }
 0x24b   : > { %4386 = vtanh.f32 %v4188_v14  ;;  %v1500_v49 = vand.u32 4294901760, %v4377_v32 }
 0x24c   : > { %4388 = vtanh.f32 %v4190_v30  ;;  %v5427_v21 = vsub.f32 %v4375_v24, %v1502_v56 }
 0x24d   : > { %v4379_v37 = vpop.eup %4378  ;;  %v5430_v45 = vsub.f32 %v4377_v32, %v1500_v49  ;;  %v1587_v32 = vsub.f32 %v5433_v44, %v1586_v26 }
 0x24e   : > { %v4381_v27 = vpop.eup %4380  ;;  %v1506_v46 = vand.u32 4294901760, %v4379_v37  ;;  %v1625_v25 = vand.u32 4294901760, %v5427_v21 }
 0x24f   : > { %v1504_v15 = vand.u32 4294901760, %v4381_v27  ;;  %v1619_v1 = vand.u32 4294901760, %v5430_v45 }
 0x250   : > { %v5441_v35 = vpack.c.bf16 %v1506_v46, %v1502_v56  ;;  %v5443_v58 = vsub.f32 %v4379_v37, %v1506_v46  ;;  %v1626_v6 = vsub.f32 %v5427_v21, %v1625_v25 }
 0x251   : > { %v4383_v55 = vpop.eup %4382  ;;  %v5450_v38 = vpack.c.bf16 %v1504_v15, %v1500_v49  ;;  %v5452_v43 = vsub.f32 %v4381_v27, %v1504_v15  ;;  %v1620_v16 = vsub.f32 %v5430_v45, %v1619_v1 }
 0x252   : > { %v4385_v40 = vpop.eup %4384  ;;  %v1510_v2 = vand.u32 4294901760, %v4383_v55  ;;  %v1637_v7 = vand.u32 4294901760, %v5443_v58  ;;  %v4049_v42 = vpack.c.bf16 %v5443_v58, %v5427_v21  ;;  %v1627_v61 = vand.u32 4294901760, %v1626_v6 }
 0x253   : > { %4032 = vmatprep.subr.bf16.mxu1 %v5450_v38  ;;  %v1508_v3 = vand.u32 4294901760, %v4385_v40  ;;  %v1631_v11 = vand.u32 4294901760, %v5452_v43  ;;  %v4047_v36 = vpack.c.bf16 %v5452_v43, %v5430_v45  ;;  %v1621_v28 = vand.u32 4294901760, %v1620_v16 }
 0x254   : > { %4034 = vmatpush1.bf16.msra.mxu1 %v5441_v35  ;;  %v5466_v57 = vsub.f32 %v4383_v55, %v1510_v2  ;;  %v1638_v29 = vsub.f32 %v5443_v58, %v1637_v7  ;;  %v5472_v34 = vpack.c.bf16 %v1637_v7, %v1625_v25 }
 0x255   : > { %v4387_v20 = vpop.eup %4386  ;;  %v5474_v48 = vsub.f32 %v4385_v40, %v1508_v3  ;;  %v1632_v52 = vsub.f32 %v5452_v43, %v1631_v11  ;;  %v5479_v0 = vpack.c.bf16 %v1631_v11, %v1619_v1  ;;  %v1588_v1 = vand.u32 4294901760, %v1587_v32 }
 0x256   : > { %v4389_v17 = vpop.eup %4388  ;;  %v1514_v41 = vand.u32 4294901760, %v4387_v20  ;;  %v1639_v59 = vand.u32 4294901760, %v1638_v29  ;;  %v1649_v22 = vand.u32 4294901760, %v5466_v57 }
 0x257   : > { %v1512_v8 = vand.u32 4294901760, %v4389_v17  ;;  %v1633_v60 = vand.u32 4294901760, %v1632_v52  ;;  %v1643_v54 = vand.u32 4294901760, %v5474_v48 }
 0x258   : > { %v5483_v31 = vpack.c.bf16 %v1514_v41, %v1510_v2  ;;  %v1660_v62 = vsub.f32 %v4387_v20, %v1514_v41  ;;  %v4041_v63 = vpack.c.bf16 %v1639_v59, %v1627_v61  ;;  %v1650_v30 = vsub.f32 %v5466_v57, %v1649_v22 }
 0x259   : > { %v5485_v24 = vpack.c.bf16 %v1512_v8, %v1508_v3  ;;  %v1654_v14 = vsub.f32 %v4389_v17, %v1512_v8  ;;  %v4039_v39 = vpack.c.bf16 %v1633_v60, %v1621_v28  ;;  %v1644_v37 = vsub.f32 %v5474_v48, %v1643_v54 }
 0x25a   : > { %v1661_v56 = vand.u32 4294901760, %v1660_v62  ;;  %v4053_v49 = vpack.c.bf16 %v1660_v62, %v5466_v57  ;;  %v1651_v10 = vand.u32 4294901760, %v1650_v30  ;;  %v1608_v2 = vand.u32 4294901760, %v5496_v9 }
 0x25b   : > { %4036 = vmatprep.subr.bf16.mxu1 %v5485_v24  ;;  %v1655_v45 = vand.u32 4294901760, %v1654_v14  ;;  %v4051_v27 = vpack.c.bf16 %v1654_v14, %v5474_v48  ;;  %v1645_v43 = vand.u32 4294901760, %v1644_v37  ;;  %v1599_v3 = vand.u32 4294901760, %v1598_v19 }
 0x25c   : > { %4038 = vmatpush1.bf16.msra.mxu1 %v5483_v31  ;;  %v1662_v46 = vsub.f32 %v1660_v62, %v1661_v56  ;;  %v4069_v25 = vpack.c.bf16 %v1661_v56, %v1649_v22  ;;  %v1609_v16 = vsub.f32 %v5496_v9, %v1608_v2 }
 0x25d   : > { %4040 = vmatprep.subr.bf16.mxu1 %v4039_v39  ;;  %v1656_v12 = vsub.f32 %v1654_v14, %v1655_v45  ;;  %v4067_v15 = vpack.c.bf16 %v1655_v45, %v1643_v54  ;;  %v3586_v54 = vld [vmem:[%s5818_s3 + $0x30] sm:$0xff] }
 0x25e   : > { %v1663_v55 = vand.u32 4294901760, %v1662_v46  ;;  %v1610_v11 = vand.u32 4294901760, %v1609_v16  ;;  %v2235_v39 = vsel %vm1487_vm1, %v3586_v54, 0 }
 0x25f   : > { %1578 = vmatmul.mubr.f32.vlgmr.msra.gmra.mrb[8].mxu1 %v1577_v4  ;;  %v1657_v40 = vand.u32 4294901760, %v1656_v12  ;;  %v5603_v46 = vand.u32 4294901760, %v2235_v39 }
 0x260   : > { %4042 = vmatpush1.bf16.msra.mxu1 %v4041_v63  ;;  %1583 = vmatprep.mubr.f32.mxu1 %v4487_v51  ;;  %v4045_v6 = vpack.c.bf16 %v1663_v55, %v1651_v10 }
 0x261   : > { %v4043_v7 = vpack.c.bf16 %v1657_v40, %v1645_v43 }
 0x263   : > { %1589 = vmatmul.mubr.f32.gmra.mrb[10].mxu1 %v1588_v1  ;;  %4044 = vmatprep.subr.bf16.mxu1 %v4043_v7 }
 0x264   : > { %4046 = vmatpush1.bf16.msra.mxu1 %v4045_v6  ;;  %1594 = vmatprep.mubr.f32.mxu1 %v4487_v51 }
 0x265   : > { %4048 = vmatprep.subr.bf16.mxu1 %v4047_v36  ;;  %v3585_v36 = vld [vmem:[%s5818_s3 + $0x28] sm:$0xff] }
 0x266   : > { %v2232_v52 = vsel %vm1487_vm1, %v3585_v36, 0 }
 0x267   : > { %1600 = vmatmul.mubr.f32.gmra.mrb[12].mxu1 %v1599_v3  ;;  %v5577_v22 = vand.u32 4294901760, %v2232_v52 }
 0x268   : > { %1605 = vmatprep.mubr.f32.mxu1 %v4487_v51 }
 0x269   : > { %v5588_v14 = vsub.f32 %v2232_v52, %v5577_v22 }
 0x26b   : > { %1611 = vmatmul.mubr.f32.gmra.mrb[14].mxu1 %v1610_v11  ;;  %v2326_v1 = vand.u32 4294901760, %v5588_v14 }
 0x26c   : > { %1721 = vmatprep.mubr.f32.mxu1 %v4487_v51 }
 0x26f   : > { %1723 = vmatmul.mubr.f32.vlgmr.msra.gmra.mrb[8].mxu1 %v5416_v23 }
 0x270   : > { %4050 = vmatpush1.bf16.msra.mxu1 %v4049_v42  ;;  %1728 = vmatprep.mubr.f32.mxu1 %v4487_v51 }
 0x271   : > { %4052 = vmatprep.subr.bf16.mxu1 %v4051_v27 }
 0x273   : > { %1730 = vmatmul.mubr.f32.gmra.mrb[10].mxu1 %v5422_v33 }
 0x274   : > { %4054 = vmatpush1.bf16.msra.mxu1 %v4053_v49  ;;  %1735 = vmatprep.mubr.f32.mxu1 %v4487_v51 }
 0x275   : > { %4056 = vmatprep.subr.bf16.mxu1 %v5450_v38 }
 0x277   : > { %1737 = vmatmul.mubr.f32.gmra.mrb[12].mxu1 %v5448_v18 }
 0x278   : > { %1742 = vmatprep.mubr.f32.mxu1 %v4487_v51 }
 0x27b   : > { %1744 = vmatmul.mubr.f32.gmra.mrb[14].mxu1 %v5477_v53 }
 0x27c   : > { %1830 = vmatprep.mubr.f32.mxu1 %v4487_v51 }
 0x27f   : > { %1833 = vmatmul.mubr.f32.vlgmr.msra.gmra.mrb[8].mxu1 %v5420_v13  ;;  %v1470_v13 = vpop.permute.xlu0 %1469 }
 0x280   : > { %4058 = vmatpush1.bf16.msra.mxu1 %v5441_v35  ;;  %1838 = vmatprep.mubr.f32.mxu1 %v4487_v51 }
 0x281   : > { %4060 = vmatprep.subr.bf16.mxu1 %v5485_v24 }
 0x283   : > { %1841 = vmatmul.mubr.f32.gmra.mrb[10].mxu1 %v5433_v44  ;;  %v1480_v57 = vpop.permute.xlu0 %1479 }
 0x284   : > { %4062 = vmatpush1.bf16.msra.mxu1 %v5483_v31  ;;  %1846 = vmatprep.mubr.f32.mxu1 %v4487_v51 }
 0x285   : > { %4064 = vmatprep.subr.bf16.mxu1 %v5479_v0 }
 0x287   : > { %1849 = vmatmul.mubr.f32.gmra.mrb[12].mxu1 %v5470_v47 }
 0x288   : > { %1854 = vmatprep.mubr.f32.mxu1 %v4487_v51 }
 0x28b   : > { %1857 = vmatmul.mubr.f32.gmra.mrb[14].mxu1 %v5496_v9 }
 0x28c   : > { %1935 = vmatprep.mubr.f32.mxu1 %v4487_v51 }
 0x28f   : > { %1939 = vmatmul.mubr.f32.vlgmr.msra.gmra.mrb[8].mxu1 %v1575_v50 }
 0x290   : > { %4066 = vmatpush1.bf16.msra.mxu1 %v5472_v34  ;;  %1944 = vmatprep.mubr.f32.mxu1 %v4487_v51 }
 0x291   : > { %4068 = vmatprep.subr.bf16.mxu1 %v4067_v15 }
 0x293   : > { %1948 = vmatmul.mubr.f32.gmra.mrb[10].mxu1 %v1586_v26 }
 0x294   : > { %4070 = vmatpush1.bf16.msra.mxu1 %v4069_v25  ;;  %1953 = vmatprep.mubr.f32.mxu1 %v4487_v51 }
 0x295   : > { %4072 = vmatprep.subr.bf16.mxu1 %v5450_v38 }
 0x297   : > { %1957 = vmatmul.mubr.f32.gmra.mrb[12].mxu1 %v1597_v5  ;;  %v3587_v5 = vld [vmem:[%s5818_s3 + $0x38] sm:$0xff] }
 0x298   : > { %1962 = vmatprep.mubr.f32.mxu1 %v4487_v51  ;;  %v2238_v10 = vsel %vm1487_vm1, %v3587_v5, 0 }
 0x29b   : > { %1966 = vmatmul.mubr.f32.gmra.mrb[14].mxu1 %v1608_v2 }
 0x29c   : > { %2060 = vmatprep.mubr.f32.mxu1 %v4487_v51 }
 0x29f   : > { %2062 = vmatmul.mubr.f32.vlgmr.msra.gmra.mrb[8].mxu1 %v5416_v23 }
 0x2a0   : > { %4074 = vmatpush1.bf16.msra.mxu1 %v5441_v35  ;;  %2067 = vmatprep.mubr.f32.mxu1 %v4487_v51 }
 0x2a1   : > { %4076 = vmatprep.subr.bf16.mxu1 %v5485_v24 }
 0x2a3   : > { %2069 = vmatmul.mubr.f32.gmra.mrb[10].mxu1 %v5422_v33 }
 0x2a4   : > { %4078 = vmatpush1.bf16.msra.mxu1 %v5483_v31  ;;  %2074 = vmatprep.mubr.f32.mxu1 %v4487_v51 }
 0x2a7   : > { %2076 = vmatmul.mubr.f32.gmra.mrb[12].mxu1 %v5448_v18 }
 0x2a8   : > { %2081 = vmatprep.mubr.f32.mxu1 %v4487_v51 }
 0x2ab   : > { %2083 = vmatmul.mubr.f32.gmra.mrb[14].mxu1 %v5477_v53 }
 0x2ac   : > { %2161 = vmatprep.mubr.f32.mxu1 %v4487_v51 }
 0x2af   : > { %2163 = vmatmul.mubr.f32.vlgmr.msra.gmra.mrb[8].mxu1 %v5416_v23  ;;  %v3584_v23 = vld [vmem:[%s5818_s3 + $0x20] sm:$0xff] }
 0x2b0   : > { %2168 = vmatprep.mubr.f32.mxu1 %v4487_v51  ;;  %v2229_v26 = vsel %vm1487_vm1, %v3584_v23, 0 }
 0x2b1   : > { %v5571_v47 = vand.u32 4294901760, %v2229_v26 }
 0x2b3   : > { %2170 = vmatmul.mubr.f32.gmra.mrb[10].mxu1 %v5422_v33  ;;  %v1475_v33 = vpop.permute.xlu1 %1474  ;;  %v5575_v17 = vsub.f32 %v2229_v26, %v5571_v47 }
 0x2b4   : > { %2175 = vmatprep.mubr.f32.mxu1 %v4487_v51 }
 0x2b5   : > { %v2315_v4 = vand.u32 4294901760, %v5575_v17 }
 0x2b7   : > { %2177 = vmatmul.mubr.f32.gmra.mrb[12].mxu1 %v5448_v18  ;;  %v2316_v27 = vsub.f32 %v5575_v17, %v2315_v4 }
 0x2b8   : > { %2182 = vmatprep.mubr.f32.mxu1 %v4487_v51 }
 0x2bb   : > { %2184 = vmatmul.mubr.f32.gmra.mrb[14].mxu1 %v5477_v53  ;;  %v1485_v53 = vpop.permute.xlu1 %1484 }
 0x2bc   : > { %2312 = vmatprep.mubr.f32.mxu1 %v4487_v51 }
 0x382   : > { %v2164_v21 = vpop.f32.mrb[8].mxu1 }
 0x383   : > { %v4191_v50 = vadd.f32 %v2164_v21, %v1470_v13  ;;  %v2166_v44 = vpop.f32.mrb[9].mxu1  ;;  %v5625_v21 = vsub.f32 %v2235_v39, %v5603_v46 }
 0x384   : > { %v4192_v35 = vadd.f32 %v2166_v44, %v1470_v13 }
 0x385   : > { %4390 = vtanh.f32 %v4191_v50  ;;  %v2337_v54 = vand.u32 4294901760, %v5625_v21 }
 0x386   : > { %4392 = vtanh.f32 %v4192_v35  ;;  %v2171_v58 = vpop.f32.mrb[10].mxu1 }
 0x387   : > { %v4193_v18 = vadd.f32 %v2171_v58, %v1475_v33  ;;  %v2173_v38 = vpop.f32.mrb[11].mxu1 }
 0x388   : > { %v4194_v42 = vadd.f32 %v2173_v38, %v1475_v33  ;;  %v5632_v33 = vand.u32 4294901760, %v2238_v10 }
 0x389   : > { %4394 = vtanh.f32 %v4193_v18 }
 0x38a   : > { %4396 = vtanh.f32 %v4194_v42  ;;  %v2178_v29 = vpop.f32.mrb[12].mxu1  ;;  %v5651_v39 = vsub.f32 %v2238_v10, %v5632_v33  ;;  %v2338_v10 = vsub.f32 %v5625_v21, %v2337_v54 }
 0x38b   : > { %v4195_v34 = vadd.f32 %v2178_v29, %v1480_v57  ;;  %v2180_v20 = vpop.f32.mrb[13].mxu1 }
 0x38c   : > { %v4196_v48 = vadd.f32 %v2180_v20, %v1480_v57 }
 0x38d   : > { %4398 = vtanh.f32 %v4195_v34 }
 0x38e   : > { %4400 = vtanh.f32 %v4196_v48  ;;  %v2185_v0 = vpop.f32.mrb[14].mxu1 }
 0x38f   : > { %v4391_v41 = vpop.eup %4390  ;;  %v4197_v61 = vadd.f32 %v2185_v0, %v1485_v53  ;;  %v2187_v59 = vpop.f32.mrb[15].mxu1 }
 0x390   : > { %v4393_v8 = vpop.eup %4392  ;;  %v4198_v28 = vadd.f32 %v2187_v59, %v1485_v53  ;;  %v2242_v60 = vand.u32 4294901760, %v4391_v41  ;;  %v2317_v53 = vand.u32 4294901760, %v2316_v27 }
 0x391   : > { %4402 = vtanh.f32 %v4197_v61  ;;  %v2240_v31 = vand.u32 4294901760, %v4393_v8 }
 0x392   : > { %4404 = vtanh.f32 %v4198_v28  ;;  %v5582_v62 = vsub.f32 %v4391_v41, %v2242_v60 }
 0x393   : > { %v4395_v63 = vpop.eup %4394  ;;  %v5585_v24 = vsub.f32 %v4393_v8, %v2240_v31  ;;  %v2327_v8 = vsub.f32 %v5588_v14, %v2326_v1 }
 0x394   : > { %v4397_v32 = vpop.eup %4396  ;;  %v2246_v30 = vand.u32 4294901760, %v4395_v63  ;;  %v2365_v56 = vand.u32 4294901760, %v5582_v62 }
 0x395   : > { %v2244_v49 = vand.u32 4294901760, %v4397_v32  ;;  %v2359_v37 = vand.u32 4294901760, %v5585_v24 }
 0x396   : > { %v5596_v45 = vpack.c.bf16 %v2246_v30, %v2242_v60  ;;  %v5598_v9 = vsub.f32 %v4395_v63, %v2246_v30  ;;  %v2366_v40 = vsub.f32 %v5582_v62, %v2365_v56 }
 0x397   : > { %v4399_v25 = vpop.eup %4398  ;;  %v5605_v12 = vpack.c.bf16 %v2244_v49, %v2240_v31  ;;  %v5607_v15 = vsub.f32 %v4397_v32, %v2244_v49  ;;  %v2360_v7 = vsub.f32 %v5585_v24, %v2359_v37 }
 0x398   : > { %v4401_v55 = vpop.eup %4400  ;;  %v2250_v43 = vand.u32 4294901760, %v4399_v25  ;;  %v2377_v19 = vand.u32 4294901760, %v5598_v9  ;;  %v4097_v2 = vpack.c.bf16 %v5598_v9, %v5582_v62  ;;  %v2367_v26 = vand.u32 4294901760, %v2366_v40 }
 0x399   : > { %4080 = vmatprep.subr.bf16.mxu1 %v5605_v12  ;;  %v2248_v6 = vand.u32 4294901760, %v4401_v55  ;;  %v2371_v3 = vand.u32 4294901760, %v5607_v15  ;;  %v4095_v16 = vpack.c.bf16 %v5607_v15, %v5585_v24  ;;  %v2361_v29 = vand.u32 4294901760, %v2360_v7 }
 0x39a   : > { %4082 = vmatpush1.bf16.msra.mxu1 %v5596_v45  ;;  %v5621_v11 = vsub.f32 %v4399_v25, %v2250_v43  ;;  %v2378_v13 = vsub.f32 %v5598_v9, %v2377_v19  ;;  %v5627_v50 = vpack.c.bf16 %v2377_v19, %v2365_v56 }
 0x39b   : > { %v4403_v44 = vpop.eup %4402  ;;  %v5629_v35 = vsub.f32 %v4401_v55, %v2248_v6  ;;  %v2372_v23 = vsub.f32 %v5607_v15, %v2371_v3  ;;  %v5634_v58 = vpack.c.bf16 %v2371_v3, %v2359_v37  ;;  %v2328_v37 = vand.u32 4294901760, %v2327_v8 }
 0x39c   : > { %v4405_v18 = vpop.eup %4404  ;;  %v2254_v38 = vand.u32 4294901760, %v4403_v44  ;;  %v2379_v42 = vand.u32 4294901760, %v2378_v13  ;;  %v2389_v36 = vand.u32 4294901760, %v5621_v11 }
 0x39d   : > { %v2252_v57 = vand.u32 4294901760, %v4405_v18  ;;  %v2373_v34 = vand.u32 4294901760, %v2372_v23  ;;  %v2383_v20 = vand.u32 4294901760, %v5629_v35 }
 0x39e   : > { %v5638_v48 = vpack.c.bf16 %v2254_v38, %v2250_v43  ;;  %v2400_v52 = vsub.f32 %v4403_v44, %v2254_v38  ;;  %v4089_v0 = vpack.c.bf16 %v2379_v42, %v2367_v26  ;;  %v2390_v28 = vsub.f32 %v5621_v11, %v2389_v36 }
 0x39f   : > { %v5640_v41 = vpack.c.bf16 %v2252_v57, %v2248_v6  ;;  %v2394_v61 = vsub.f32 %v4405_v18, %v2252_v57  ;;  %v4087_v59 = vpack.c.bf16 %v2373_v34, %v2361_v29  ;;  %v2384_v63 = vsub.f32 %v5629_v35, %v2383_v20 }
 0x3a0   : > { %v2401_v60 = vand.u32 4294901760, %v2400_v52  ;;  %v4101_v31 = vpack.c.bf16 %v2400_v52, %v5621_v11  ;;  %v2391_v27 = vand.u32 4294901760, %v2390_v28  ;;  %v2348_v43 = vand.u32 4294901760, %v5651_v39 }
 0x3a1   : > { %4084 = vmatprep.subr.bf16.mxu1 %v5640_v41  ;;  %v2395_v24 = vand.u32 4294901760, %v2394_v61  ;;  %v4099_v32 = vpack.c.bf16 %v2394_v61, %v5629_v35  ;;  %v2385_v15 = vand.u32 4294901760, %v2384_v63  ;;  %v2339_v6 = vand.u32 4294901760, %v2338_v10 }
 0x3a2   : > { %4086 = vmatpush1.bf16.msra.mxu1 %v5638_v48  ;;  %v2402_v30 = vsub.f32 %v2400_v52, %v2401_v60  ;;  %v4117_v56 = vpack.c.bf16 %v2401_v60, %v2389_v36  ;;  %v2349_v7 = vsub.f32 %v5651_v39, %v2348_v43 }
 0x3a3   : > { %4088 = vmatprep.subr.bf16.mxu1 %v4087_v59  ;;  %v2396_v5 = vsub.f32 %v2394_v61, %v2395_v24  ;;  %v4115_v49 = vpack.c.bf16 %v2395_v24, %v2383_v20 }
 0x3a4   : > { %v2403_v25 = vand.u32 4294901760, %v2402_v30  ;;  %v2350_v3 = vand.u32 4294901760, %v2349_v7 }
 0x3a5   : > { %2318 = vmatmul.mubr.f32.vlgmr.msra.gmra.mrb[16].mxu1 %v2317_v53  ;;  %v2397_v55 = vand.u32 4294901760, %v2396_v5 }
 0x3a6   : > { %4090 = vmatpush1.bf16.msra.mxu1 %v4089_v0  ;;  %2323 = vmatprep.mubr.f32.mxu1 %v4487_v51  ;;  %v4093_v40 = vpack.c.bf16 %v2403_v25, %v2391_v27 }
 0x3a7   : > { %v4091_v19 = vpack.c.bf16 %v2397_v55, %v2385_v15 }
 0x3a9   : > { %2329 = vmatmul.mubr.f32.gmra.mrb[18].mxu1 %v2328_v37  ;;  %4092 = vmatprep.subr.bf16.mxu1 %v4091_v19 }
 0x3aa   : > { %4094 = vmatpush1.bf16.msra.mxu1 %v4093_v40  ;;  %2334 = vmatprep.mubr.f32.mxu1 %v4487_v51 }
 0x3ab   : > { %4096 = vmatprep.subr.bf16.mxu1 %v4095_v16 }
 0x3ad   : > { %2340 = vmatmul.mubr.f32.gmra.mrb[20].mxu1 %v2339_v6 }
 0x3ae   : > { %2345 = vmatprep.mubr.f32.mxu1 %v4487_v51 }
 0x3b1   : > { %2351 = vmatmul.mubr.f32.gmra.mrb[22].mxu1 %v2350_v3 }
 0x3b2   : > { %2461 = vmatprep.mubr.f32.mxu1 %v4487_v51 }
 0x3b5   : > { %2463 = vmatmul.mubr.f32.vlgmr.msra.gmra.mrb[16].mxu1 %v5571_v47 }
 0x3b6   : > { %4098 = vmatpush1.bf16.msra.mxu1 %v4097_v2  ;;  %2468 = vmatprep.mubr.f32.mxu1 %v4487_v51 }
 0x3b7   : > { %4100 = vmatprep.subr.bf16.mxu1 %v4099_v32 }
 0x3b9   : > { %2470 = vmatmul.mubr.f32.gmra.mrb[18].mxu1 %v5577_v22 }
 0x3ba   : > { %4102 = vmatpush1.bf16.msra.mxu1 %v4101_v31  ;;  %2475 = vmatprep.mubr.f32.mxu1 %v4487_v51 }
 0x3bb   : > { %4104 = vmatprep.subr.bf16.mxu1 %v5605_v12 }
 0x3bd   : > { %2477 = vmatmul.mubr.f32.gmra.mrb[20].mxu1 %v5603_v46 }
 0x3be   : > { %2482 = vmatprep.mubr.f32.mxu1 %v4487_v51 }
 0x3c1   : > { %2484 = vmatmul.mubr.f32.gmra.mrb[22].mxu1 %v5632_v33 }
 0x3c2   : > { %2570 = vmatprep.mubr.f32.mxu1 %v4487_v51 }
 0x3c5   : > { %2573 = vmatmul.mubr.f32.vlgmr.msra.gmra.mrb[16].mxu1 %v5575_v17  ;;  %v2211_v17 = vpop.permute.xlu0 %2210 }
 0x3c6   : > { %4106 = vmatpush1.bf16.msra.mxu1 %v5596_v45  ;;  %2578 = vmatprep.mubr.f32.mxu1 %v4487_v51 }
 0x3c7   : > { %4108 = vmatprep.subr.bf16.mxu1 %v5640_v41 }
 0x3c9   : > { %2581 = vmatmul.mubr.f32.gmra.mrb[18].mxu1 %v5588_v14  ;;  %v2221_v2 = vpop.permute.xlu0 %2220 }
 0x3ca   : > { %4110 = vmatpush1.bf16.msra.mxu1 %v5638_v48  ;;  %2586 = vmatprep.mubr.f32.mxu1 %v4487_v51 }
 0x3cb   : > { %4112 = vmatprep.subr.bf16.mxu1 %v5634_v58 }
 0x3cd   : > { %2589 = vmatmul.mubr.f32.gmra.mrb[20].mxu1 %v5625_v21 }
 0x3ce   : > { %2594 = vmatprep.mubr.f32.mxu1 %v4487_v51 }
 0x3d1   : > { %2597 = vmatmul.mubr.f32.gmra.mrb[22].mxu1 %v5651_v39 }
 0x3d2   : > { %2675 = vmatprep.mubr.f32.mxu1 %v4487_v51 }
 0x3d5   : > { %2679 = vmatmul.mubr.f32.vlgmr.msra.gmra.mrb[16].mxu1 %v2315_v4 }
 0x3d6   : > { %4114 = vmatpush1.bf16.msra.mxu1 %v5627_v50  ;;  %2684 = vmatprep.mubr.f32.mxu1 %v4487_v51 }
 0x3d7   : > { %4116 = vmatprep.subr.bf16.mxu1 %v4115_v49 }
 0x3d9   : > { %2688 = vmatmul.mubr.f32.gmra.mrb[18].mxu1 %v2326_v1 }
 0x3da   : > { %4118 = vmatpush1.bf16.msra.mxu1 %v4117_v56  ;;  %2693 = vmatprep.mubr.f32.mxu1 %v4487_v51 }
 0x3db   : > { %4120 = vmatprep.subr.bf16.mxu1 %v5605_v12 }
 0x3dd   : > { %2697 = vmatmul.mubr.f32.gmra.mrb[20].mxu1 %v2337_v54 }
 0x3de   : > { %2702 = vmatprep.mubr.f32.mxu1 %v4487_v51 }
 0x3e1   : > { %2706 = vmatmul.mubr.f32.gmra.mrb[22].mxu1 %v2348_v43 }
 0x3e2   : > { %2800 = vmatprep.mubr.f32.mxu1 %v4487_v51 }
 0x3e5   : > { %2802 = vmatmul.mubr.f32.vlgmr.msra.gmra.mrb[16].mxu1 %v5571_v47 }
 0x3e6   : > { %4122 = vmatpush1.bf16.msra.mxu1 %v5596_v45  ;;  %2807 = vmatprep.mubr.f32.mxu1 %v4487_v51 }
 0x3e7   : > { %4124 = vmatprep.subr.bf16.mxu1 %v5640_v41 }
 0x3e9   : > { %2809 = vmatmul.mubr.f32.gmra.mrb[18].mxu1 %v5577_v22 }
 0x3ea   : > { %4126 = vmatpush1.bf16.msra.mxu1 %v5638_v48  ;;  %2814 = vmatprep.mubr.f32.mxu1 %v4487_v51 }
 0x3ed   : > { %2816 = vmatmul.mubr.f32.gmra.mrb[20].mxu1 %v5603_v46 }
 0x3ee   : > { %2821 = vmatprep.mubr.f32.mxu1 %v4487_v51 }
 0x3f1   : > { %2823 = vmatmul.mubr.f32.gmra.mrb[22].mxu1 %v5632_v33 }
 0x3f2   : > { %2901 = vmatprep.mubr.f32.mxu1 %v4487_v51 }
 0x3f5   : > { %2903 = vmatmul.mubr.f32.vlgmr.msra.gmra.mrb[16].mxu1 %v5571_v47  ;;  %v2216_v47 = vpop.permute.xlu1 %2215 }
 0x3f6   : > { %2908 = vmatprep.mubr.f32.mxu1 %v4487_v51 }
 0x3f9   : > { %2910 = vmatmul.mubr.f32.gmra.mrb[18].mxu1 %v5577_v22  ;;  %v2226_v44 = vpop.permute.xlu1 %2225 }
 0x3fa   : > { %2915 = vmatprep.mubr.f32.mxu1 %v4487_v51 }
 0x3fd   : > { %2917 = vmatmul.mubr.f32.gmra.mrb[20].mxu1 %v5603_v46  ;;  %v2938_v46 = vld [vmem:[%s5820_s5] sm:$0x3] }
 0x3fe   : > { %2922 = vmatprep.mubr.f32.mxu1 %v4487_v51  ;;  %v2946_v50 = vsel %vm1487_vm1, %v2938_v46, 0 }
 0x3ff   : > { %v5723_v18 = vand.u32 4294901760, %v2946_v50 }
 0x401   : > { %2924 = vmatmul.mubr.f32.gmra.mrb[22].mxu1 %v5632_v33  ;;  %v5730_v20 = vsub.f32 %v2946_v50, %v5723_v18 }
 0x402   : > { %3020 = vmatprep.mubr.f32.mxu1 %v4487_v51 }
 0x403   : > { %v3023_v54 = vand.u32 4294901760, %v5730_v20 }
 0x405   : > { %v3024_v43 = vsub.f32 %v5730_v20, %v3023_v54 }
 0x4c8   : > { %v2904_v62 = vpop.f32.mrb[16].mxu1 }
 0x4c9   : > { %v4199_v4 = vadd.f32 %v2904_v62, %v2211_v17  ;;  %v2906_v14 = vpop.f32.mrb[17].mxu1 }
 0x4ca   : > { %v4200_v45 = vadd.f32 %v2906_v14, %v2211_v17 }
 0x4cb   : > { %4406 = vtanh.f32 %v4199_v4 }
 0x4cc   : > { %4408 = vtanh.f32 %v4200_v45  ;;  %v2911_v9 = vpop.f32.mrb[18].mxu1 }
 0x4cd   : > { %v4201_v22 = vadd.f32 %v2911_v9, %v2216_v47  ;;  %v2913_v12 = vpop.f32.mrb[19].mxu1 }
 0x4ce   : > { %v4202_v1 = vadd.f32 %v2913_v12, %v2216_v47 }
 0x4cf   : > { %4410 = vtanh.f32 %v4201_v22 }
 0x4d0   : > { %4412 = vtanh.f32 %v4202_v1  ;;  %v2918_v16 = vpop.f32.mrb[20].mxu1 }
 0x4d1   : > { %v4203_v11 = vadd.f32 %v2918_v16, %v2221_v2  ;;  %v2920_v13 = vpop.f32.mrb[21].mxu1 }
 0x4d2   : > { %v4204_v21 = vadd.f32 %v2920_v13, %v2221_v2  ;;  %v3025_v13 = vand.u32 4294901760, %v3024_v43 }
 0x4d3   : > { %4414 = vtanh.f32 %v4203_v11 }
 0x4d4   : > { %4416 = vtanh.f32 %v4204_v21  ;;  %v2925_v35 = vpop.f32.mrb[22].mxu1 }
 0x4d5   : > { %v4407_v23 = vpop.eup %4406  ;;  %v4205_v33 = vadd.f32 %v2925_v35, %v2226_v44  ;;  %v2927_v58 = vpop.f32.mrb[23].mxu1 }
 0x4d6   : > { %v4409_v38 = vpop.eup %4408  ;;  %v4206_v26 = vadd.f32 %v2927_v58, %v2226_v44  ;;  %v2950_v42 = vand.u32 4294901760, %v4407_v23 }
 0x4d7   : > { %4418 = vtanh.f32 %v4205_v33  ;;  %v2948_v36 = vand.u32 4294901760, %v4409_v38 }
 0x4d8   : > { %4420 = vtanh.f32 %v4206_v26  ;;  %v5725_v57 = vsub.f32 %v4407_v23, %v2950_v42 }
 0x4d9   : > { %v4411_v29 = vpop.eup %4410  ;;  %v5727_v34 = vsub.f32 %v4409_v38, %v2948_v36 }
 0x4da   : > { %v4413_v48 = vpop.eup %4412  ;;  %v2954_v52 = vand.u32 4294901760, %v4411_v29  ;;  %v3040_v53 = vand.u32 4294901760, %v5725_v57 }
 0x4db   : > { %v2952_v0 = vand.u32 4294901760, %v4413_v48  ;;  %v3034_v41 = vand.u32 4294901760, %v5727_v34 }
 0x4dc   : > { %v5734_v61 = vpack.c.bf16 %v2954_v52, %v2950_v42  ;;  %v5736_v59 = vsub.f32 %v4411_v29, %v2954_v52  ;;  %v3041_v24 = vsub.f32 %v5725_v57, %v3040_v53 }
 0x4dd   : > { %v4415_v8 = vpop.eup %4414  ;;  %v5738_v28 = vpack.c.bf16 %v2952_v0, %v2948_v36  ;;  %v3045_v60 = vsub.f32 %v4413_v48, %v2952_v0  ;;  %v3035_v56 = vsub.f32 %v5727_v34, %v3034_v41 }
 0x4de   : > { %v4417_v31 = vpop.eup %4416  ;;  %v2958_v63 = vand.u32 4294901760, %v4415_v8  ;;  %v3052_v39 = vand.u32 4294901760, %v5736_v59  ;;  %v4145_v32 = vpack.c.bf16 %v5736_v59, %v5725_v57  ;;  %v3042_v7 = vand.u32 4294901760, %v3041_v24 }
 0x4df   : > { %4128 = vmatprep.subr.bf16.mxu1 %v5738_v28  ;;  %v2956_v30 = vand.u32 4294901760, %v4417_v31  ;;  %v3046_v5 = vand.u32 4294901760, %v3045_v60  ;;  %v4143_v49 = vpack.c.bf16 %v3045_v60, %v5727_v34  ;;  %v3036_v4 = vand.u32 4294901760, %v3035_v56  ;;  %v2943_v34 = vpop.permute.xlu0 %2942 }
 0x4e0   : > { %4130 = vmatpush1.bf16.msra.mxu1 %v5734_v61  ;;  %v3063_v37 = vsub.f32 %v4415_v8, %v2958_v63  ;;  %v3053_v27 = vsub.f32 %v5736_v59, %v3052_v39  ;;  %v4161_v25 = vpack.c.bf16 %v3052_v39, %v3040_v53 }
 0x4e1   : > { %v4419_v15 = vpop.eup %4418  ;;  %v3057_v55 = vsub.f32 %v4417_v31, %v2956_v30  ;;  %v3047_v10 = vsub.f32 %v3045_v60, %v3046_v5  ;;  %v4159_v40 = vpack.c.bf16 %v3046_v5, %v3034_v41 }
 0x4e2   : > { %v4421_v19 = vpop.eup %4420  ;;  %v2962_v6 = vand.u32 4294901760, %v4419_v15  ;;  %v3054_v3 = vand.u32 4294901760, %v3053_v27  ;;  %v3064_v17 = vand.u32 4294901760, %v3063_v37 }
 0x4e3   : > { %v2960_v62 = vand.u32 4294901760, %v4421_v19  ;;  %v3048_v14 = vand.u32 4294901760, %v3047_v10  ;;  %v3058_v45 = vand.u32 4294901760, %v3057_v55 }
 0x4e4   : > { %v4133_v47 = vpack.c.bf16 %v2962_v6, %v2958_v63  ;;  %v3075_v9 = vsub.f32 %v4419_v15, %v2962_v6  ;;  %v4137_v22 = vpack.c.bf16 %v3054_v3, %v3042_v7  ;;  %v3065_v2 = vsub.f32 %v3063_v37, %v3064_v17 }
 0x4e5   : > { %v4131_v12 = vpack.c.bf16 %v2960_v62, %v2956_v30  ;;  %v3069_v1 = vsub.f32 %v4421_v19, %v2960_v62  ;;  %v4135_v46 = vpack.c.bf16 %v3048_v14, %v3036_v4  ;;  %v3059_v21 = vsub.f32 %v3057_v55, %v3058_v45 }
 0x4e6   : > { %v3076_v16 = vand.u32 4294901760, %v3075_v9  ;;  %v4149_v11 = vpack.c.bf16 %v3075_v9, %v3063_v37  ;;  %v3066_v38 = vand.u32 4294901760, %v3065_v2 }
 0x4e7   : > { %4132 = vmatprep.subr.bf16.mxu1 %v4131_v12  ;;  %v3070_v50 = vand.u32 4294901760, %v3069_v1  ;;  %v4147_v44 = vpack.c.bf16 %v3069_v1, %v3057_v55  ;;  %v3060_v42 = vand.u32 4294901760, %v3059_v21 }
 0x4e8   : > { %4134 = vmatpush1.bf16.msra.mxu1 %v4133_v47  ;;  %v3077_v35 = vsub.f32 %v3075_v9, %v3076_v16  ;;  %v4165_v23 = vpack.c.bf16 %v3076_v16, %v3064_v17 }
 0x4e9   : > { %4136 = vmatprep.subr.bf16.mxu1 %v4135_v46  ;;  %v3071_v33 = vsub.f32 %v3069_v1, %v3070_v50  ;;  %v4163_v58 = vpack.c.bf16 %v3070_v50, %v3058_v45 }
 0x4ea   : > { %v3078_v26 = vand.u32 4294901760, %v3077_v35 }
 0x4eb   : > { %3026 = vmatmul.mubr.f32.vlgmr.msra.gmra.mrb[24].mxu1 %v3025_v13  ;;  %v3072_v36 = vand.u32 4294901760, %v3071_v33 }
 0x4ec   : > { %4138 = vmatpush1.bf16.msra.mxu1 %v4137_v22  ;;  %v4141_v57 = vpack.c.bf16 %v3078_v26, %v3066_v38  ;;  %3136 = vmatprep.mubr.f32.mxu1 %v4487_v51 }
 0x4ed   : > { %v4139_v29 = vpack.c.bf16 %v3072_v36, %v3060_v42 }
 0x4ef   : > { %4140 = vmatprep.subr.bf16.mxu1 %v4139_v29 }
 0x4f0   : > { %4142 = vmatpush1.bf16.msra.mxu1 %v4141_v57 }
 0x4f1   : > { %4144 = vmatprep.subr.bf16.mxu1 %v4143_v49 }
 0x4f3   : > { %3138 = vmatmul.mubr.f32.vlgmr.msra.gmra.mrb[24].mxu1 %v5723_v18 }
 0x4f4   : > { %4146 = vmatpush1.bf16.msra.mxu1 %v4145_v32  ;;  %3224 = vmatprep.mubr.f32.mxu1 %v4487_v51 }
 0x4f5   : > { %4148 = vmatprep.subr.bf16.mxu1 %v4147_v44 }
 0x4f8   : > { %4150 = vmatpush1.bf16.msra.mxu1 %v4149_v11 }
 0x4f9   : > { %4152 = vmatprep.subr.bf16.mxu1 %v5738_v28 }
 0x4fb   : > { %3227 = vmatmul.mubr.f32.vlgmr.msra.gmra.mrb[24].mxu1 %v5730_v20 }
 0x4fc   : > { %4154 = vmatpush1.bf16.msra.mxu1 %v5734_v61  ;;  %3305 = vmatprep.mubr.f32.mxu1 %v4487_v51 }
 0x4fd   : > { %4156 = vmatprep.subr.bf16.mxu1 %v4131_v12 }
 0x500   : > { %4158 = vmatpush1.bf16.msra.mxu1 %v4133_v47 }
 0x501   : > { %4160 = vmatprep.subr.bf16.mxu1 %v4159_v40 }
 0x503   : > { %3309 = vmatmul.mubr.f32.vlgmr.msra.gmra.mrb[24].mxu1 %v3023_v54 }
 0x504   : > { %4162 = vmatpush1.bf16.msra.mxu1 %v4161_v25  ;;  %3403 = vmatprep.mubr.f32.mxu1 %v4487_v51 }
 0x505   : > { %4164 = vmatprep.subr.bf16.mxu1 %v4163_v58 }
 0x508   : > { %4166 = vmatpush1.bf16.msra.mxu1 %v4165_v23 }
 0x509   : > { %4168 = vmatprep.subr.bf16.mxu1 %v5738_v28 }
 0x50b   : > { %3405 = vmatmul.mubr.f32.vlgmr.msra.gmra.mrb[24].mxu1 %v5723_v18 }
 0x50c   : > { %4170 = vmatpush1.bf16.msra.mxu1 %v5734_v61  ;;  %3483 = vmatprep.mubr.f32.mxu1 %v4487_v51 }
 0x50d   : > { %4172 = vmatprep.subr.bf16.mxu1 %v4131_v12 }
 0x510   : > { %4174 = vmatpush1.bf16.msra.mxu1 %v4133_v47 }
 0x513   : > { %3485 = vmatmul.mubr.f32.vlgmr.msra.gmra.mrb[24].mxu1 %v5723_v18 }
 0x5e6   : > { %v3486_v20 = vpop.f32.mrb[24].mxu1 }
 0x5e7   : > { %v4207_v48 = vadd.f32 %v3486_v20, %v2943_v34  ;;  %v3488_v52 = vpop.f32.mrb[25].mxu1 }
 0x5e8   : > { %v4208_v53 = vadd.f32 %v3488_v52, %v2943_v34 }
 0x5ea   : > { %v3493_v0 = vcombine.low %v4207_v48, %v4208_v53 }
 0x5ec   : > { %3592 = vst.sshfl [vmem:[%s272_s17] sm:$0x33 pattern:$0x76325410] %v3493_v0 }
 0x5ed   : > { %4435 = shalt.err (!%p4432_p3)
}
 0x5ee   : > { %s4436_s9 = scalar_lea.hbm %s5773_s21, 64  ;;  %s4440_s15 = scalar_lea.hbm %s5822_s7, 128 }
 0x5ef   : > { %p4437_p4 = scmp.ne.s32.totalorder %s5773_s21, %s4436_s9  ;;  %p4441_p9 = scmp.lt.u32.totalorder %s5773_s21, %s5822_s7 }
 0x5f0   : > { %p4442_p10 = scmp.lt.u32.totalorder %s4440_s15, %s4436_s9  ;;  %p4444_p12 = scmp.lt.u32.totalorder %s4436_s9, %s5773_s21 }
 0x5f1   : > { %p4438_p7 = pnand %p4437_p4, %p4567_p5 }
 0x5f2   : > { %p4443_p11 = por %p4442_p10, %p4441_p9 }
 0x5f3   : > { %p4439_p8 = pneg %p4438_p7 }
 0x5f4   : > { %p4445_p13 = por %p4444_p12, %p4443_p11 }
 0x5f6   : > { %p4446_p0 = pnand %p4445_p13, %p4439_p8 }
 0x5f8   : > { %4449 = shalt.err (!%p4446_p0)
}
 0x5f9   : > { %4331 = dma.vmem_to_hbm [thread:$0]  (%p4567_p5), %s5775_s18, 64, %s5773_s21, %s3504_s22  }
 0x5fa PF: > { %p4337_p1 = scmp.ge.s32.totalorder %s4484_s27, 2  ;;  %s3530_s19 = sand.u32 1, %s4472_s24  }
 0x5fb   : > { %s3531_s20 = scalar_lea.sflag [#allocation3], %s3530_s19 }
 0x5fc   : > { %p4334_p2 = pnand %p4337_p1, %p4571_p6 }
 0x5fe   : > { %4467 = dma.done.wait (!%p4334_p2), %s3531_s20, 64  }
 0x5ff   : > { %4469 = vsyncadd (!%p4334_p2), %s3531_s20, 4294967232  ;;  %p17_p3 = scmp.ge.s32.totalorder %s4554_s30, 4   ;;  %s6038_s24 = smov %s4476_s25 }
 0x600   : > { %s6039_s25 = smov %s4480_s26  ;;  %s6040_s26 = smov %s4565_s10 }
 0x601   : > { %s6041_s27 = smov %s4554_s30  ;;  %19 = sbr.rel (!%p17_p3) target bundleno = 3 (0x3), region = 85 }
 0x608   :  { %3536 = vsyncpa [#allocation3], 1 }
 0x609   :  { %3538 = vsyncpa [#allocation3 + $0x1], 1 }

</bundles_post_ra>
